<compile_context>
chip_gen: v6e
topology: v6e:2x2x1
jax: 0.10.0
libtpu: 0.0.40
codegen_flags: <defaults>
</compile_context>

<pallas_src>
import jax
import jax.numpy as jnp
from jax.experimental import pallas as pl
from jax.experimental.pallas import tpu as pltpu

BUDGET_BYTES = 16 * 1024 * 1024          # per-grid-step budget for row-tiled operands
ROW_CAP = 65536
_VMEM_LIMIT = 48 * 1024 * 1024           # <= v7x physical VMEM (64 MiB / TC)
_CP_PAR = pltpu.CompilerParams(dimension_semantics=("parallel",),
                               vmem_limit_bytes=_VMEM_LIMIT)
_CP_ARB = pltpu.CompilerParams(dimension_semantics=("arbitrary",),
                               vmem_limit_bytes=_VMEM_LIMIT)


# ----------------------------------------------------------------------------- helpers
def _triple(v):
    if isinstance(v, (list, tuple)):
        return tuple(int(q) for q in v)
    return (int(v),) * 3


def _round_up(x, m):
    return (x + m - 1) // m * m


def _cl(n):                              # lane-padded width (VMEM minor dim = 128)
    return _round_up(int(n), 128)


def _pad_rows(a, m_pad):
    if a.shape[0] == m_pad:
        return a
    return jnp.pad(a, ((0, m_pad - a.shape[0]), (0, 0)))


def _pad_cols(a, n_pad):
    if a.shape[1] == n_pad:
        return a
    return jnp.pad(a, ((0, 0), (0, n_pad - a.shape[1])))


def _tile_rows(M, row_bytes, align=128, cap=ROW_CAP):
    """Pick a row-tile so one grid step touches ~BUDGET_BYTES of VMEM."""
    tm = BUDGET_BYTES // max(int(row_bytes), 1)
    tm = max(align, min(cap, tm))
    tm -= tm % align
    tm = min(tm, _round_up(M, align))
    return tm, _round_up(M, tm)


# ----------------------------------------------------------------------------- Pallas kernels
def _gemm_bias_kernel(a_ref, w_ref, b_ref, o_ref):
    o_ref[...] = (jnp.dot(a_ref[...], w_ref[...],
                          preferred_element_type=jnp.float32) + b_ref[...])


def _gemm_bias_stats_kernel(a_ref, w_ref, b_ref, o_ref, s_ref, ss_ref):
    y = (jnp.dot(a_ref[...], w_ref[...], preferred_element_type=jnp.float32)
         + b_ref[...])
    o_ref[...] = y

    @pl.when(pl.program_id(0) == 0)
    def _init():
        s_ref[...] = jnp.zeros_like(s_ref)
        ss_ref[...] = jnp.zeros_like(ss_ref)

    s_ref[...] += jnp.sum(y, axis=0, keepdims=True)
    ss_ref[...] += jnp.sum(y * y, axis=0, keepdims=True)


def _gemm_bias_mul_kernel(a_ref, w_ref, b_ref, p_ref, o_ref):
    o_ref[...] = (jnp.dot(a_ref[...], w_ref[...],
                          preferred_element_type=jnp.float32)
                  + b_ref[...]) * p_ref[...]


def _attn_conv1_psi_kernel(a_ref, w_ref, b_ref, g_ref, wp_ref, bp_ref, psi_ref):
    # psi = sigmoid(psi_conv(relu(conv1(x1) + g1))), fully fused in one GEMM.
    h = (jnp.dot(a_ref[...], w_ref[...], preferred_element_type=jnp.float32)
         + b_ref[...] + g_ref[...])
    h = jnp.maximum(h, 0.0)
    psi_ref[...] = jax.nn.sigmoid(
        jnp.dot(h, wp_ref[...], preferred_element_type=jnp.float32) + bp_ref[...])


def _gemm_nt_kernel(w_ref, a_ref, b_ref, o_ref):
    o_ref[...] = (jnp.dot(w_ref[...], a_ref[...],
                          preferred_element_type=jnp.float32) + b_ref[...])


def _gemm_nt_sigmoid_kernel(w_ref, a_ref, b_ref, o_ref):
    o_ref[...] = jax.nn.sigmoid(
        jnp.dot(w_ref[...], a_ref[...], preferred_element_type=jnp.float32)
        + b_ref[...])


def _scale_shift_relu_kernel(x_ref, s_ref, t_ref, o_ref):
    o_ref[...] = jnp.maximum(x_ref[...] * s_ref[...] + t_ref[...], 0.0)


def _scale_shift_add_relu_kernel(x_ref, r_ref, s_ref, t_ref, o_ref):
    o_ref[...] = jnp.maximum(x_ref[...] * s_ref[...] + t_ref[...] + r_ref[...],
                             0.0)


# ----------------------------------------------------------------------------- GEMM wrappers
def matmul_bias(a, w, bias):
    """a: (M,K), w: (K,N), bias: (N,) -> (M,N) f32."""
    M, K = a.shape
    N = w.shape[1]
    a = a.astype(jnp.bfloat16)
    w = w.astype(jnp.bfloat16)
    tm, m_pad = _tile_rows(M, 2 * _cl(K) + 4 * _cl(N))
    out = pl.pallas_call(
        _gemm_bias_kernel,
        out_shape=jax.ShapeDtypeStruct((m_pad, N), jnp.float32),
        grid=(m_pad // tm,),
        in_specs=[pl.BlockSpec((tm, K), lambda i: (i, 0)),
                  pl.BlockSpec((K, N), lambda i: (0, 0)),
                  pl.BlockSpec((1, N), lambda i: (0, 0))],
        out_specs=pl.BlockSpec((tm, N), lambda i: (i, 0)),
        compiler_params=_CP_PAR,
    )(_pad_rows(a, m_pad), w, bias.reshape(1, N).astype(jnp.float32))
    return out[:M]


def matmul_bias_stats(a, w, bias):
    """GEMM + bias with fused per-channel sum / sum-of-squares accumulators.

    Returns (out (M,N) f32, mean (N,), biased batch var (N,))."""
    M, K = a.shape
    N = w.shape[1]
    a = a.astype(jnp.bfloat16)
    w = w.astype(jnp.bfloat16)
    b = bias.reshape(1, N).astype(jnp.float32)
    tm, m_pad = _tile_rows(M, 2 * _cl(K) + 4 * _cl(N))
    out, s, ss = pl.pallas_call(
        _gemm_bias_stats_kernel,
        out_shape=(jax.ShapeDtypeStruct((m_pad, N), jnp.float32),
                   jax.ShapeDtypeStruct((1, N), jnp.float32),
                   jax.ShapeDtypeStruct((1, N), jnp.float32)),
        grid=(m_pad // tm,),
        in_specs=[pl.BlockSpec((tm, K), lambda i: (i, 0)),
                  pl.BlockSpec((K, N), lambda i: (0, 0)),
                  pl.BlockSpec((1, N), lambda i: (0, 0))],
        out_specs=(pl.BlockSpec((tm, N), lambda i: (i, 0)),
                   pl.BlockSpec((1, N), lambda i: (0, 0)),
                   pl.BlockSpec((1, N), lambda i: (0, 0))),
        compiler_params=_CP_ARB,        # accumulator outputs -> sequential grid
    )(_pad_rows(a, m_pad), w, b)
    # Zero-padded A rows contribute exactly `bias` to the sums; remove them.
    n_pad = float(m_pad - M)
    s = s - n_pad * b
    ss = ss - n_pad * b * b
    mean = (s / M).reshape(N)
    # E[x^2]-E[x]^2 (clamped); batch-training-mode stats like a fresh nn.Module.
    var = jnp.maximum((ss / M).reshape(N) - mean * mean, 0.0)
    return out[:M], mean, var


def matmul_bias_mul(a, w, bias, p):
    """(a @ w + bias) * p, with p a per-row gate of shape (M, 1)."""
    M, K = a.shape
    N = w.shape[1]
    a = a.astype(jnp.bfloat16)
    w = w.astype(jnp.bfloat16)
    tm, m_pad = _tile_rows(M, 2 * _cl(K) + 4 * _cl(N) + 4 * 128)
    out = pl.pallas_call(
        _gemm_bias_mul_kernel,
        out_shape=jax.ShapeDtypeStruct((m_pad, N), jnp.float32),
        grid=(m_pad // tm,),
        in_specs=[pl.BlockSpec((tm, K), lambda i: (i, 0)),
                  pl.BlockSpec((K, N), lambda i: (0, 0)),
                  pl.BlockSpec((1, N), lambda i: (0, 0)),
                  pl.BlockSpec((tm, 1), lambda i: (i, 0))],
        out_specs=pl.BlockSpec((tm, N), lambda i: (i, 0)),
        compiler_params=_CP_PAR,
    )(_pad_rows(a, m_pad), w, bias.reshape(1, N).astype(jnp.float32),
      _pad_rows(p.reshape(M, 1).astype(jnp.float32), m_pad))
    return out[:M]


def attn_conv1_psi(a, w, bias, g, wp, bp):
    """psi = sigmoid(psi_conv(relu(a @ w + bias + g))) in one fused GEMM."""
    M, K = a.shape
    a = a.astype(jnp.bfloat16)
    w = w.astype(jnp.bfloat16)
    tm, m_pad = _tile_rows(M, 2 * _cl(K) + 4 * _cl(K) + 4 * 128)
    out = pl.pallas_call(
        _attn_conv1_psi_kernel,
        out_shape=jax.ShapeDtypeStruct((m_pad, 1), jnp.float32),
        grid=(m_pad // tm,),
        in_specs=[pl.BlockSpec((tm, K), lambda i: (i, 0)),
                  pl.BlockSpec((K, K), lambda i: (0, 0)),
                  pl.BlockSpec((1, K), lambda i: (0, 0)),
                  pl.BlockSpec((tm, K), lambda i: (i, 0)),
                  pl.BlockSpec((K, 1), lambda i: (0, 0)),
                  pl.BlockSpec((1, 1), lambda i: (0, 0))],
        out_specs=pl.BlockSpec((tm, 1), lambda i: (i, 0)),
        compiler_params=_CP_PAR,
    )(_pad_rows(a, m_pad), w, bias.reshape(1, K).astype(jnp.float32),
      _pad_rows(g.astype(jnp.float32), m_pad),
      wp.reshape(K, 1).astype(jnp.float32),
      bp.reshape(1, 1).astype(jnp.float32))
    return out[:M]


def matmul_nt_bias(at, wrow, bias, apply_sigmoid=False):
    """Lane-dense single-output-channel GEMM: out (M,) = wrow(1,K) @ at(K,M) + b."""
    K, M = at.shape
    at = at.astype(jnp.bfloat16)
    wrow = wrow.reshape(1, K).astype(jnp.bfloat16)
    col_bytes = 2 * _round_up(K, 16) + 4 * 8
    tn, m_pad = _tile_rows(M, col_bytes, align=128)
    kern = _gemm_nt_sigmoid_kernel if apply_sigmoid else _gemm_nt_kernel
    out = pl.pallas_call(
        kern,
        out_shape=jax.ShapeDtypeStruct((1, m_pad), jnp.float32),
        grid=(m_pad // tn,),
        in_specs=[pl.BlockSpec((1, K), lambda i: (0, 0)),
                  pl.BlockSpec((K, tn), lambda i: (0, i)),
                  pl.BlockSpec((1, 1), lambda i: (0, 0))],
        out_specs=pl.BlockSpec((1, tn), lambda i: (0, i)),
        compiler_params=_CP_PAR,
    )(wrow, _pad_cols(at, m_pad), jnp.reshape(bias, (1, 1)).astype(jnp.float32))
    return out[0, :M]


# ----------------------------------------------------------------------------- BatchNorm apply (lane-dense)
def _bn_apply_relu(x2d, scale, shift, residual2d=None):
    """relu(x*scale + shift (+res)) over (M, C); C divides 128 -> lane-dense."""
    M, C = x2d.shape
    assert 128 % C == 0
    rep = 128 // C
    L = M * C
    Lp = _round_up(L, 128)

    def _to_rows(t):
        f = t.reshape(-1).astype(jnp.float32)
        if Lp != L:
            f = jnp.pad(f, (0, Lp - L))
        return f.reshape(-1, 128)

    xr = _to_rows(x2d)
    R = xr.shape[0]
    n_big = 2 if residual2d is None else 3
    tr, r_pad = _tile_rows(R, 512 * n_big, align=8)
    xr = _pad_rows(xr, r_pad)
    s_t = jnp.tile(scale.reshape(1, C).astype(jnp.float32), (1, rep))
    t_t = jnp.tile(shift.reshape(1, C).astype(jnp.float32), (1, rep))
    if residual2d is None:
        out = pl.pallas_call(
            _scale_shift_relu_kernel,
            out_shape=jax.ShapeDtypeStruct((r_pad, 128), jnp.float32),
            grid=(r_pad // tr,),
            in_specs=[pl.BlockSpec((tr, 128), lambda i: (i, 0)),
                      pl.BlockSpec((1, 128), lambda i: (0, 0)),
                      pl.BlockSpec((1, 128), lambda i: (0, 0))],
            out_specs=pl.BlockSpec((tr, 128), lambda i: (i, 0)),
            compiler_params=_CP_PAR,
        )(xr, s_t, t_t)
    else:
        rr = _pad_rows(_to_rows(residual2d), r_pad)
        out = pl.pallas_call(
            _scale_shift_add_relu_kernel,
            out_shape=jax.ShapeDtypeStruct((r_pad, 128), jnp.float32),
            grid=(r_pad // tr,),
            in_specs=[pl.BlockSpec((tr, 128), lambda i: (i, 0)),
                      pl.BlockSpec((tr, 128), lambda i: (i, 0)),
                      pl.BlockSpec((1, 128), lambda i: (0, 0)),
                      pl.BlockSpec((1, 128), lambda i: (0, 0))],
            out_specs=pl.BlockSpec((tr, 128), lambda i: (i, 0)),
            compiler_params=_CP_PAR,
        )(xr, rr, s_t, t_t)
    return out.reshape(-1)[:L].reshape(M, C)


# ----------------------------------------------------------------------------- conv glue (im2col -> Pallas GEMM)
def _pad_input(x, pd):
    return jnp.pad(x, ((0, 0), (pd[0], pd[0]), (pd[1], pd[1]), (pd[2], pd[2]),
                       (0, 0)))


def _conv_out_dims(xp_shape, k, st, dl):
    dp, hp, wp = xp_shape[1], xp_shape[2], xp_shape[3]
    do = (dp - dl[0] * (k[0] - 1) - 1) // st[0] + 1
    ho = (hp - dl[1] * (k[1] - 1) - 1) // st[1] + 1
    wo = (wp - dl[2] * (k[2] - 1) - 1) // st[2] + 1
    return do, ho, wo


def _tap_slice(xp, zd, zh, zw, st, dl, do, ho, wo):
    return xp[:, zd * dl[0]: zd * dl[0] + (do - 1) * st[0] + 1: st[0],
                 zh * dl[1]: zh * dl[1] + (ho - 1) * st[1] + 1: st[1],
                 zw * dl[2]: zw * dl[2] + (wo - 1) * st[2] + 1: st[2], :]


def _im2col(x, k, st, pd, dl):
    """im2col A (M, K) in (tap-major, cin-minor) column order, bf16."""
    cin = x.shape[-1]
    n = x.shape[0]
    xp = _pad_input(x, pd).astype(jnp.bfloat16)
    do, ho, wo = _conv_out_dims(xp.shape, k, st, dl)
    assert do > 0 and ho > 0 and wo > 0
    if k == (1, 1, 1):
        a = _tap_slice(xp, 0, 0, 0, st, dl, do, ho, wo).reshape(-1, cin)
    else:
        taps = [_tap_slice(xp, zd, zh, zw, st, dl, do, ho, wo)
                for zd in range(k[0]) for zh in range(k[1]) for zw in range(k[2])]
        a = jnp.stack(taps, axis=-2).reshape(-1, k[0] * k[1] * k[2] * cin)
    return a, (n, do, ho, wo)


def _im2col_T(x, k, st, pd, dl):
    """Transposed im2col A^T (K, M), same column order as _im2col, bf16."""
    cin = x.shape[-1]
    n = x.shape[0]
    xp = _pad_input(x, pd).astype(jnp.bfloat16)
    do, ho, wo = _conv_out_dims(xp.shape, k, st, dl)
    assert do > 0 and ho > 0 and wo > 0
    rows = []
    for zd in range(k[0]):
        for zh in range(k[1]):
            for zw in range(k[2]):
                win = _tap_slice(xp, zd, zh, zw, st, dl, do, ho, wo)
                rows.append(jnp.moveaxis(win, -1, 0).reshape(cin, -1))
    return jnp.concatenate(rows, axis=0), (n, do, ho, wo)


def conv3d(x, w, bias, stride=1, padding=0, dilation=1, mul=None,
           apply_sigmoid=False):
    """x: (N,D,H,W,Cin); w: (kd,kh,kw,Cin,Cout); bias: (Cout,).
    mul: optional per-position gate (M,1) multiplied into the output (fused).
    apply_sigmoid: fused sigmoid epilogue (Cout==1 path only)."""
    kd, kh, kw, cin, cout = w.shape
    k = (kd, kh, kw)
    st, pd, dl = _triple(stride), _triple(padding), _triple(dilation)
    if cout == 1 and mul is None:
        at, (n, do, ho, wo) = _im2col_T(x, k, st, pd, dl)
        out = matmul_nt_bias(at, w.reshape(1, -1), bias, apply_sigmoid)
        return out.reshape(n, do, ho, wo, 1)
    a, (n, do, ho, wo) = _im2col(x, k, st, pd, dl)
    wm = w.reshape(-1, cout)
    if mul is not None:
        out = matmul_bias_mul(a, wm, bias, mul)
    else:
        out = matmul_bias(a, wm, bias)
    return out.reshape(n, do, ho, wo, cout)


def conv3d_bn_relu(x, conv_p, bn_p, stride, padding, residual=None, eps=1e-5):
    """Conv3d (dilation=2) with fused batch-stat epilogue + BN(+res)+ReLU."""
    w, b = conv_p
    gamma, beta = bn_p
    kd, kh, kw, cin, cout = w.shape
    a, (n, do, ho, wo) = _im2col(x, (kd, kh, kw), _triple(stride),
                                 _triple(padding), _triple(2))
    out2d, mean, var = matmul_bias_stats(a, w.reshape(-1, cout), b)
    scale = gamma / jnp.sqrt(var + eps)
    shift = beta - mean * scale
    res2d = None if residual is None else residual.reshape(-1, cout)
    y = _bn_apply_relu(out2d, scale, shift, res2d)
    return y.reshape(n, do, ho, wo, cout)


def _pad_or_crop(arr, axis, q):
    if q == 0:
        return arr
    if q > 0:
        pads = [(0, 0)] * arr.ndim
        pads[axis] = (q, q)
        return jnp.pad(arr, pads)
    sl = [slice(None)] * arr.ndim
    sl[axis] = slice(-q, arr.shape[axis] + q)
    return arr[tuple(sl)]


def conv_transpose3d(x, w, bias, stride=2, padding=0):
    """x: (N,D,H,W,Cin); w: PyTorch layout (Cin,Cout,kd,kh,kw)."""
    st, pd = _triple(stride), _triple(padding)
    n, d, h, wdt, cin = x.shape
    _, cout, kd, kh, kw = w.shape
    dd, hd, wd = (d - 1) * st[0] + 1, (h - 1) * st[1] + 1, (wdt - 1) * st[2] + 1
    xd = jnp.zeros((n, dd, hd, wd, cin), x.dtype)
    xd = xd.at[:, ::st[0], ::st[1], ::st[2], :].set(x)
    xd = _pad_or_crop(xd, 1, kd - 1 - pd[0])
    xd = _pad_or_crop(xd, 2, kh - 1 - pd[1])
    xd = _pad_or_crop(xd, 3, kw - 1 - pd[2])
    # TODO(synk): sub-pixel decomposition would avoid the ~7/8 inserted zeros.
    w_conv = jnp.flip(w, axis=(2, 3, 4)).transpose(2, 3, 4, 0, 1)
    return conv3d(xd, w_conv, bias, stride=1, padding=0, dilation=1)


def crop_hw(x, top, left, height, width):
    """torchvision-style crop on H,W of NDHWC, zero-padding out-of-bounds."""
    _, _, H, W, _ = x.shape
    pt, pb = max(0, -top), max(0, top + height - H)
    plft, prgt = max(0, -left), max(0, left + width - W)
    xp = jnp.pad(x, ((0, 0), (0, 0), (pt, pb), (plft, prgt), (0, 0)))
    return xp[:, :, top + pt:top + pt + height, left + plft:left + plft + width, :]


# ----------------------------------------------------------------------------- parameters
class _KeyGen:
    def __init__(self, key):
        self._key, self._n = key, 0

    def __call__(self):
        self._n += 1
        return jax.random.fold_in(self._key, self._n)


def _conv_params(key, cin, cout, k):
    kd, kh, kw = _triple(k)
    k1, k2 = jax.random.split(key)
    fan_in = cin * kd * kh * kw
    w = jax.random.normal(k1, (kd, kh, kw, cin, cout), jnp.float32) / jnp.sqrt(float(fan_in))
    b = 0.01 * jax.random.normal(k2, (cout,), jnp.float32)
    return w, b


def _tconv_params(key, cin, cout, k):
    kd, kh, kw = _triple(k)
    k1, k2 = jax.random.split(key)
    fan = cin * kd * kh * kw
    w = jax.random.normal(k1, (cin, cout, kd, kh, kw), jnp.float32) / jnp.sqrt(float(fan))
    b = 0.01 * jax.random.normal(k2, (cout,), jnp.float32)
    return w, b


def _init_rb(kg, cin, cout):
    return {
        "conv1": _conv_params(kg(), cin, cout, 3),
        "bn1": (jnp.ones((cout,), jnp.float32), jnp.zeros((cout,), jnp.float32)),
        "conv2": _conv_params(kg(), cout, cout, 3),
        "bn2": (jnp.ones((cout,), jnp.float32), jnp.zeros((cout,), jnp.float32)),
        "skip": _conv_params(kg(), cin, cout, 1) if cin != cout else None,
    }


def _init_ag(kg, cin, cgat, cint):
    return {
        "W_g": _conv_params(kg(), cgat, cint, 1),
        "W_x": _conv_params(kg(), cin, cint, 1),
        "psi": _conv_params(kg(), cint, 1, 1),
        "tconv": _tconv_params(kg(), cint, cint, 1),
        "tconv2": _tconv_params(kg(), cint, cint, 1),
        "conv1": _conv_params(kg(), cint, cint, 1),
        "conv2": _conv_params(kg(), cint, cint, 1),
    }


def init_params(key):
    kg = _KeyGen(key)
    P = {}
    P["encoder1"] = _init_rb(kg, 1, 8)
    P["encoder2"] = _init_rb(kg, 8, 16)
    P["encoder3"] = _init_rb(kg, 16, 32)
    P["encoder4"] = _init_rb(kg, 32, 64)
    P["bottleneck"] = _init_rb(kg, 64, 128)
    P["tconvd4"] = _tconv_params(kg(), 128, 64, 3)
    P["decoder4"] = _init_rb(kg, 64, 64)
    P["Conv3d4"] = _conv_params(kg(), 64, 64, 1)
    P["att4"] = _init_ag(kg, 64, 64, 64)
    P["decoder4b"] = _conv_params(kg(), 128, 64, 1)
    P["tconvd3"] = _tconv_params(kg(), 64, 32, 3)
    P["decoder3"] = _init_rb(kg, 32, 32)
    P["Conv3d3"] = _conv_params(kg(), 32, 32, 1)
    P["att3"] = _init_ag(kg, 32, 32, 32)
    P["decoder3b"] = _conv_params(kg(), 64, 32, 1)
    P["tconvd2"] = _tconv_params(kg(), 32, 16, 3)
    P["decoder2"] = _init_rb(kg, 16, 16)
    P["Conv3d2"] = _conv_params(kg(), 16, 16, 1)
    P["att2"] = _init_ag(kg, 16, 16, 16)
    P["decoder2b"] = _conv_params(kg(), 32, 16, 1)
    P["tconvd1"] = _tconv_params(kg(), 16, 8, 3)
    P["decoder1"] = _init_rb(kg, 8, 8)
    P["Conv3d1"] = _conv_params(kg(), 8, 8, 1)
    P["att1"] = _init_ag(kg, 8, 8, 8)
    P["decoder1b"] = _conv_params(kg(), 16, 8, 1)
    P["final_conv"] = _conv_params(kg(), 8, 1, 3)
    P["final_conv2"] = _conv_params(kg(), 1, 1, 3)
    P["final_conv3"] = _conv_params(kg(), 1, 1, 3)
    return P


# ----------------------------------------------------------------------------- module forwards
def residual_block(p, x, stride, pad1, pad2):
    if p["skip"] is None:
        identity = x                      # in==out blocks always use stride 1 here
    else:
        identity = conv3d(x, *p["skip"], stride=stride, padding=0, dilation=1)
    out = conv3d_bn_relu(x, p["conv1"], p["bn1"], stride, pad1)
    out = conv3d_bn_relu(out, p["conv2"], p["bn2"], 1, pad2, residual=identity)
    return out


def attention_gate(p, x, g, padg, padx, padp, padt, padt2, padc, padc2):
    assert _triple(padp) == (0, 0, 0)     # psi conv padding is 0 in the module
    cint = p["W_g"][0].shape[-1]
    g1 = conv3d(g, *p["W_g"], stride=1, padding=padg, dilation=2)
    x1 = conv3d(x, *p["W_x"], stride=1, padding=padx, dilation=2)
    x1 = conv_transpose3d(x1, *p["tconv"], stride=2, padding=padt)
    # fused: psi = sigmoid(psi_conv(relu(conv1(x1) + g1)))
    w1, b1 = p["conv1"]
    wp, bp = p["psi"]
    a, _ = _im2col(x1, (1, 1, 1), (1, 1, 1), _triple(padc), (1, 1, 1))
    psi = attn_conv1_psi(a, w1.reshape(cint, cint), b1, g1.reshape(-1, cint),
                         wp.reshape(cint, 1), bp)
    # gated output: conv2(tconv2(x)) * psi (multiply fused into the conv GEMM)
    xo = conv_transpose3d(x, *p["tconv2"], stride=2, padding=padt2)
    return conv3d(xo, *p["conv2"], stride=1, padding=padc2, dilation=1, mul=psi)


def forward(P, x_ncdhw):
    x = jnp.transpose(x_ncdhw.astype(jnp.float32), (0, 2, 3, 4, 1))  # NCDHW->NDHWC
    e1 = residual_block(P["encoder1"], x, 2, 0, 3)
    e2 = residual_block(P["encoder2"], e1, 2, 2, 2)
    e3 = residual_block(P["encoder3"], e2, 2, 2, 2)
    e4 = residual_block(P["encoder4"], e3, 2, 2, 2)
    b = residual_block(P["bottleneck"], e4, 1, 2, 2)

    d4 = conv_transpose3d(b, *P["tconvd4"], stride=2, padding=0)
    d4 = residual_block(P["decoder4"], d4, 1, 2, 2)
    d4c = conv3d(d4, *P["Conv3d4"], stride=1, padding=(1, 1, 1))
    a4 = attention_gate(P["att4"], e4, d4, padg=(1, 1, 1), padx=(1, 1, 1), padp=0,
                        padt=(1, 1, 1), padt2=(1, 1, 1), padc=(1, 1, 1),
                        padc2=(3, 3, 3))
    d4 = jnp.concatenate([a4, d4c], axis=-1)
    d4 = conv3d(d4, *P["decoder4b"], stride=1, padding=(1, 1, 1))

    d3 = conv_transpose3d(d4, *P["tconvd3"], stride=2, padding=0)
    d3 = residual_block(P["decoder3"], d3, 1, 2, 2)
    d3c = conv3d(d3, *P["Conv3d3"], stride=1, padding=(0, 1, 1))
    a3 = attention_gate(P["att3"], e3, d3, padg=(0, 1, 1), padx=0, padp=0,
                        padt=0, padt2=0, padc=(7, 7, 7), padc2=(7, 7, 7))
    d3 = jnp.concatenate([a3, d3c], axis=-1)
    d3 = conv3d(d3, *P["decoder3b"], stride=1, padding=(0, 1, 1))

    d2 = conv_transpose3d(d3, *P["tconvd2"], stride=2, padding=0)
    d2 = residual_block(P["decoder2"], d2, 1, 2, 2)
    d2c = conv3d(d2, *P["Conv3d2"], stride=1, padding=(0, 1, 1))
    a2 = attention_gate(P["att2"], e2, d2, padg=(0, 1, 1), padx=0, padp=0,
                        padt=0, padt2=0, padc=(14, 18, 18), padc2=(14, 18, 18))
    d2 = jnp.concatenate([a2, d2c], axis=-1)
    d2 = conv3d(d2, *P["decoder2b"], stride=1, padding=(0, 1, 1))

    d1 = conv_transpose3d(d2, *P["tconvd1"], stride=2, padding=0)
    d1 = residual_block(P["decoder1"], d1, 1, 2, 2)
    d1c = conv3d(d1, *P["Conv3d1"], stride=1, padding=(0, 1, 1))
    a1 = attention_gate(P["att1"], e1, d1, padg=(0, 1, 1), padx=0, padp=0,
                        padt=0, padt2=0, padc=(28, 39, 39), padc2=(28, 39, 39))
    d1 = jnp.concatenate([a1, d1c], axis=-1)
    d1 = conv3d(d1, *P["decoder1b"], stride=1, padding=(0, 1, 1))

    out = conv3d(d1, *P["final_conv"], stride=1, padding=0)   # Cout=1 -> NT path
    # torch: top = int(out.shape[3] / 2) - 150  (shape[3] == H in NCDHW == axis 2 here)
    top = int(out.shape[2] / 2) - 150
    out = crop_hw(out, top, top, 300, 300)
    out = out[:, int(77 / 2 - 23 / 2):int(77 / 2 + 23 / 2), :, :, :]   # D slice 27:50
    out = conv3d(out, *P["final_conv2"], stride=1, padding=0)
    out = conv3d(out, *P["final_conv3"], stride=1, padding=2, apply_sigmoid=True)
    return jnp.transpose(out, (0, 4, 1, 2, 3))  # NDHWC -> NCDHW


# ----------------------------------------------------------------------------- main
if __name__ == "__main__":
    key = jax.random.PRNGKey(0)
    params = init_params(key)
    # Smallest input for which every layer (attention-gate transposed convs and
    # the hard-coded depth-77 / 300x300 crops) produces valid shapes:
    # (N, C, D, H, W) = (1, 1, 24, 28, 28).
    x = jax.random.normal(jax.random.fold_in(key, 12345), (1, 1, 24, 28, 28),
                          jnp.float32)
    out = forward(params, x)
    out = jax.block_until_ready(out)
    assert out.shape == (1, 1, 23, 300, 300), out.shape
    assert bool(jnp.all(jnp.isfinite(out)))
    print("KERNEL_OK")
</pallas_src>

<mosaic_0001>
module attributes {stable_mosaic.version = 11 : i64} {
  func.func @_gemm_bias_kernel(%arg0: i32, %arg1: memref<2432x1xbf16, #tpu.memory_space<vmem>>, %arg2: memref<1x8xbf16, #tpu.memory_space<vmem>>, %arg3: memref<1x8xf32, #tpu.memory_space<vmem>>, %arg4: memref<2432x8xf32, #tpu.memory_space<vmem>>) attributes {dimension_semantics = [#tpu.dimension_semantics<parallel>], iteration_bounds = array<i64: 1>, scalar_prefetch = 0 : i64, scratch_operands = 0 : i64, tpu.core_type = #tpu.core_type<tc>, window_params = [{transform_indices = @transform_0, window_bounds = array<i64: 2432, 1>}, {pipeline_mode = #tpu.pipeline_mode<synchronous>, transform_indices = @transform_1, window_bounds = array<i64: 1, 8>}, {pipeline_mode = #tpu.pipeline_mode<synchronous>, transform_indices = @transform_2, window_bounds = array<i64: 1, 8>}, {transform_indices = @transform_3, window_bounds = array<i64: 2432, 8>}]} {
    %c0 = arith.constant 0 : index
    %c0_0 = arith.constant 0 : index
    %0 = vector.load %arg1[%c0, %c0_0] : memref<2432x1xbf16, #tpu.memory_space<vmem>>, vector<2432x1xbf16>
    %c0_1 = arith.constant 0 : index
    %c0_2 = arith.constant 0 : index
    %1 = vector.load %arg2[%c0_1, %c0_2] : memref<1x8xbf16, #tpu.memory_space<vmem>>, vector<1x8xbf16>
    %cst = arith.constant dense<0.000000e+00> : vector<2432x8xf32>
    %2 = tpu.matmul %0, %1, %cst {dimension_numbers = #tpu.dot_dimension_numbers<[1], [0], [0], [1], [0, 0, 1, 1], [], []>} : vector<2432x1xbf16>, vector<1x8xbf16>, vector<2432x8xf32> -> vector<2432x8xf32>
    %c0_3 = arith.constant 0 : index
    %c0_4 = arith.constant 0 : index
    %3 = vector.load %arg3[%c0_3, %c0_4] : memref<1x8xf32, #tpu.memory_space<vmem>>, vector<1x8xf32>
    %4 = vector.broadcast %3 : vector<1x8xf32> to vector<2432x8xf32>
    %5 = arith.addf %2, %4 : vector<2432x8xf32>
    %c0_5 = arith.constant 0 : index
    %c0_6 = arith.constant 0 : index
    %6 = vector.load %arg4[%c0_5, %c0_6] : memref<2432x8xf32, #tpu.memory_space<vmem>>, vector<2432x8xf32>
    tpu.vector_store %arg4[%c0_5, %c0_6], %5 {strides = array<i32>} : memref<2432x8xf32, #tpu.memory_space<vmem>>, vector<2432x8xf32>,
    return
  }
  func.func @transform_0(%arg0: i32) -> (i32, i32) {
    %c0_i32 = arith.constant 0 : i32
    %c0_i32_0 = arith.constant 0 : i32
    return %arg0, %c0_i32 : i32, i32
  }
  func.func @transform_1(%arg0: i32) -> (i32, i32) {
    %c0_i32 = arith.constant 0 : i32
    %c0_i32_0 = arith.constant 0 : i32
    %c0_i32_1 = arith.constant 0 : i32
    return %c0_i32, %c0_i32_0 : i32, i32
  }
  func.func @transform_2(%arg0: i32) -> (i32, i32) {
    %c0_i32 = arith.constant 0 : i32
    %c0_i32_0 = arith.constant 0 : i32
    %c0_i32_1 = arith.constant 0 : i32
    return %c0_i32, %c0_i32_0 : i32, i32
  }
  func.func @transform_3(%arg0: i32) -> (i32, i32) {
    %c0_i32 = arith.constant 0 : i32
    %c0_i32_0 = arith.constant 0 : i32
    return %arg0, %c0_i32 : i32, i32
  }
}

</mosaic_0001>

<bundles_post_ra>
// kernel: tpu_custom_call.1
= control target key start
LH: loop header
LB: loop body
LE: loop exit
PB: predicated region body
PF: predicated region fallthrough
CT: control target
= control target key end

     0   :  { %8 = vsyncpa [#allocation3], 0  ;;  %s6261_s0 = inlined_call_operand.vmem [shape: bf16[2432,1], index: 0, kind: input, shape index: {}]   ;;  %s6262_s1 = inlined_call_operand.hbm [shape: bf16[1,8], index: 1, kind: input, shape index: {}]   ;;  %s6263_s2 = inlined_call_operand.hbm [shape: f32[1,8], index: 2, kind: input, shape index: {}]   ;;  %s6264_s3 = inlined_call_operand.vmem [shape: f32[2432,8], index: 3, kind: output, shape index: {}]  }
   0x1   :  { %9 = vsyncpa [#allocation5], 0  ;;  %s4100_s12 = smov [#allocation2]   ;;  %s4101_s14 = smov [#allocation4]  }
   0x2   :  { %s18_s13 = sshll.u32 %s4100_s12, 4  ;;  %s28_s15 = sshll.u32 %s4101_s14, 4  ;;  %s19_s13 = int_to_ptr.vmem [resolvable:$true] %s18_s13  ;;  %s29_s15 = int_to_ptr.vmem [resolvable:$true] %s28_s15 }
   0x3   :  { %s4064_s16 = scalar_lea.vmem %s19_s13, 16  ;;  %s4068_s17 = scalar_lea.vmem %s19_s13, 32 }
   0x4   :  { %p4065_p0 = scmp.ne.s32.totalorder %s19_s13, %s4064_s16  ;;  %p4069_p1 = scmp.lt.s32.totalorder %s19_s13, %s19_s13 }
   0x5   :  { %p4070_p2 = scmp.lt.s32.totalorder %s4068_s17, %s4064_s16 }
   0x7   :  { %p4071_p3 = por %p4070_p2, %p4069_p1 }
   0x9   :  { %p4072_p4 = pnand %p4071_p3, %p4065_p0 }
   0xb   :  { %4075 = shalt.err (!%p4072_p4)
}
   0xc   :  { %21 = dma.hbm_to_vmem [thread:$0]  %s6262_s1, 16, %s19_s13, [#allocation3]  }
   0xd   :  { %s4084_s20 = scalar_lea.vmem %s29_s15, 16  ;;  %s4088_s21 = scalar_lea.vmem %s29_s15, 32 }
   0xe   :  { %p4085_p5 = scmp.ne.s32.totalorder %s29_s15, %s4084_s20  ;;  %p4089_p6 = scmp.lt.s32.totalorder %s29_s15, %s29_s15 }
   0xf   :  { %p4090_p7 = scmp.lt.s32.totalorder %s4088_s21, %s4084_s20 }
  0x11   :  { %p4091_p8 = por %p4090_p7, %p4089_p6 }
  0x13   :  { %p4092_p9 = pnand %p4091_p8, %p4085_p5 }
  0x15   :  { %4095 = shalt.err (!%p4092_p9)
}
  0x16   :  { %31 = dma.hbm_to_vmem [thread:$0]  %s6263_s2, 16, %s29_s15, [#allocation5]  }
  0x17   :  { %4096 = dma.done.wait [#allocation3], 16  }
  0x18   :  { %4097 = vsyncadd [#allocation3], 4294967280 }
  0x19   :  { %4098 = dma.done.wait [#allocation5], 16  }
  0x1a   :  { %4099 = vsyncadd [#allocation5], 4294967280  ;;  %vm1568_vm0 = vcmask 1040384   ;;  %v4102_v0 = vmov 0   ;;  %v343_v2 = vld [vmem:[#allocation2] sm:$0x1] }
  0x1b   :  { %v1570_v1 = vsel %vm1568_vm0, 65535, %v4102_v0  ;;  %v3903_v4 = vld [vmem:[%s6261_s0] sm:$0xff]   ;;  %vm1111_vm1 = vcmask 7168   ;;  %v3905_v6 = vld [vmem:[%s6261_s0 + $0x8] sm:$0xff]   ;;  %v3907_v8 = vld [vmem:[%s6261_s0 + $0x10] sm:$0xff]   ;;  %vm2823_vm2 = vcmask 64512  }
  0x1c   :  { %v1572_v3 = vand.u32 %v1570_v1, %v343_v2  ;;  %v3904_v5 = vld [vmem:[%s6261_s0 + $0x260] sm:$0xff]   ;;  %v3906_v7 = vld [vmem:[%s6261_s0 + $0x268] sm:$0xff]   ;;  %3594 = vmatprep.mubr.msk.bf16.mxu0 %vm1111_vm1, %v3903_v4  ;;  %v3908_v9 = vld [vmem:[%s6261_s0 + $0x270] sm:$0xff]  }
  0x1d   :  { %3746 = vmatprep.mubr.msk.bf16.mxu1 %vm1111_vm1, %v3904_v5  ;;  %v3909_v10 = vld [vmem:[%s6261_s0 + $0x18] sm:$0xff]   ;;  %v3911_v12 = vld [vmem:[%s6261_s0 + $0x20] sm:$0xff]   ;;  %v3913_v14 = vld [vmem:[%s6261_s0 + $0x28] sm:$0xff]  }
  0x1e   :  { %3592 = vmatprep.subr.bf16.mxu0 %v1572_v3  ;;  %3898 = vmatprep.subr.bf16.mxu1 %v1572_v3  ;;  %v3910_v11 = vld [vmem:[%s6261_s0 + $0x278] sm:$0xff]   ;;  %v3912_v13 = vld [vmem:[%s6261_s0 + $0x280] sm:$0xff]   ;;  %v3914_v15 = vld [vmem:[%s6261_s0 + $0x288] sm:$0xff]  }
  0x1f   :  { %3593 = vmatpush3.bf16.msra.mxu0 %v1572_v3  ;;  %3899 = vmatpush3.bf16.msra.mxu1 %v1572_v3  ;;  %v3915_v16 = vld [vmem:[%s6261_s0 + $0x30] sm:$0xff]   ;;  %v3917_v18 = vld [vmem:[%s6261_s0 + $0x38] sm:$0xff]   ;;  %v3919_v20 = vld [vmem:[%s6261_s0 + $0x40] sm:$0xff]  }
  0x20   :  { %v3916_v17 = vld [vmem:[%s6261_s0 + $0x290] sm:$0xff]   ;;  %v3918_v19 = vld [vmem:[%s6261_s0 + $0x298] sm:$0xff]   ;;  %v3920_v21 = vld [vmem:[%s6261_s0 + $0x2a0] sm:$0xff]  }
  0x21   :  { %v3921_v22 = vld [vmem:[%s6261_s0 + $0x48] sm:$0xff]   ;;  %v3923_v24 = vld [vmem:[%s6261_s0 + $0x50] sm:$0xff]   ;;  %v3925_v26 = vld [vmem:[%s6261_s0 + $0x58] sm:$0xff]  }
  0x22   :  { %3595 = vmatmul.mubr.msk.bf16.vlgmr.msra.gmra.mxu0 %vm1111_vm1, %v3905_v6  ;;  %3747 = vmatmul.mubr.msk.bf16.vlgmr.msra.gmra.mxu1 %vm1111_vm1, %v3906_v7  ;;  %v3922_v23 = vld [vmem:[%s6261_s0 + $0x2a8] sm:$0xff]   ;;  %v3924_v25 = vld [vmem:[%s6261_s0 + $0x2b0] sm:$0xff]   ;;  %v3926_v27 = vld [vmem:[%s6261_s0 + $0x2b8] sm:$0xff]  }
  0x23   :  { %3598 = vmatprep.mubr.msk.bf16.mxu0 %vm1111_vm1, %v3907_v8  ;;  %3750 = vmatprep.mubr.msk.bf16.mxu1 %vm1111_vm1, %v3908_v9  ;;  %v3927_v28 = vld [vmem:[%s6261_s0 + $0x60] sm:$0xff]   ;;  %v3929_v30 = vld [vmem:[%s6261_s0 + $0x68] sm:$0xff]   ;;  %v3931_v32 = vld [vmem:[%s6261_s0 + $0x70] sm:$0xff]  }
  0x24   :  { %v3928_v29 = vld [vmem:[%s6261_s0 + $0x2c0] sm:$0xff]   ;;  %v3930_v31 = vld [vmem:[%s6261_s0 + $0x2c8] sm:$0xff]   ;;  %v3932_v33 = vld [vmem:[%s6261_s0 + $0x2d0] sm:$0xff]  }
  0x25   :  { %v3933_v34 = vld [vmem:[%s6261_s0 + $0x78] sm:$0xff]   ;;  %v3935_v36 = vld [vmem:[%s6261_s0 + $0x80] sm:$0xff]   ;;  %v3937_v38 = vld [vmem:[%s6261_s0 + $0x88] sm:$0xff]  }
  0x26   :  { %v3934_v35 = vld [vmem:[%s6261_s0 + $0x2d8] sm:$0xff]   ;;  %v3936_v37 = vld [vmem:[%s6261_s0 + $0x2e0] sm:$0xff]   ;;  %v3938_v39 = vld [vmem:[%s6261_s0 + $0x2e8] sm:$0xff]  }
  0x27   :  { %v3939_v40 = vld [vmem:[%s6261_s0 + $0x90] sm:$0xff]   ;;  %v3941_v42 = vld [vmem:[%s6261_s0 + $0x98] sm:$0xff]   ;;  %v3943_v44 = vld [vmem:[%s6261_s0 + $0xa0] sm:$0xff]  }
  0x28   :  { %v3940_v41 = vld [vmem:[%s6261_s0 + $0x2f0] sm:$0xff]   ;;  %v3942_v43 = vld [vmem:[%s6261_s0 + $0x2f8] sm:$0xff]   ;;  %v3944_v45 = vld [vmem:[%s6261_s0 + $0x300] sm:$0xff]  }
  0x29   :  { %v3945_v46 = vld [vmem:[%s6261_s0 + $0xa8] sm:$0xff]   ;;  %v3947_v48 = vld [vmem:[%s6261_s0 + $0xb0] sm:$0xff]   ;;  %v3949_v50 = vld [vmem:[%s6261_s0 + $0xb8] sm:$0xff]  }
  0x2a   :  { %3599 = vmatmul.mubr.msk.bf16.gmra.mxu0 %vm1111_vm1, %v3909_v10  ;;  %3751 = vmatmul.mubr.msk.bf16.gmra.mxu1 %vm1111_vm1, %v3910_v11  ;;  %v3946_v47 = vld [vmem:[%s6261_s0 + $0x308] sm:$0xff]   ;;  %v3948_v49 = vld [vmem:[%s6261_s0 + $0x310] sm:$0xff]   ;;  %v3950_v51 = vld [vmem:[%s6261_s0 + $0x318] sm:$0xff]  }
  0x2b   :  { %3602 = vmatprep.mubr.msk.bf16.mxu0 %vm1111_vm1, %v3911_v12  ;;  %3754 = vmatprep.mubr.msk.bf16.mxu1 %vm1111_vm1, %v3912_v13  ;;  %v3951_v52 = vld [vmem:[%s6261_s0 + $0xc0] sm:$0xff]   ;;  %v3953_v54 = vld [vmem:[%s6261_s0 + $0xc8] sm:$0xff]   ;;  %v3955_v56 = vld [vmem:[%s6261_s0 + $0xd0] sm:$0xff]  }
  0x2c   :  { %v3952_v53 = vld [vmem:[%s6261_s0 + $0x320] sm:$0xff]   ;;  %v3954_v55 = vld [vmem:[%s6261_s0 + $0x328] sm:$0xff]   ;;  %v3956_v57 = vld [vmem:[%s6261_s0 + $0x330] sm:$0xff]  }
  0x2d   :  { %v3957_v58 = vld [vmem:[%s6261_s0 + $0xd8] sm:$0xff]   ;;  %v3959_v60 = vld [vmem:[%s6261_s0 + $0xe0] sm:$0xff]   ;;  %v3961_v62 = vld [vmem:[%s6261_s0 + $0xe8] sm:$0xff]  }
  0x2e   :  { %v3958_v59 = vld [vmem:[%s6261_s0 + $0x338] sm:$0xff]   ;;  %v3960_v61 = vld [vmem:[%s6261_s0 + $0x340] sm:$0xff]   ;;  %v3962_v63 = vld [vmem:[%s6261_s0 + $0x348] sm:$0xff]  }
  0x2f   :  { %v3963_v0 = vld [vmem:[%s6261_s0 + $0xf0] sm:$0xff]   ;;  %v3965_v2 = vld [vmem:[%s6261_s0 + $0xf8] sm:$0xff]   ;;  %v3967_v4 = vld [vmem:[%s6261_s0 + $0x100] sm:$0xff]  }
  0x30   :  { %v3964_v1 = vld [vmem:[%s6261_s0 + $0x350] sm:$0xff]   ;;  %v3966_v3 = vld [vmem:[%s6261_s0 + $0x358] sm:$0xff]   ;;  %v3968_v5 = vld [vmem:[%s6261_s0 + $0x360] sm:$0xff]  }
  0x31   :  { %v3969_v6 = vld [vmem:[%s6261_s0 + $0x108] sm:$0xff]   ;;  %v3971_v8 = vld [vmem:[%s6261_s0 + $0x110] sm:$0xff]   ;;  %v3973_v10 = vld [vmem:[%s6261_s0 + $0x118] sm:$0xff]  }
  0x32   :  { %3603 = vmatmul.mubr.msk.bf16.gmra.mxu0 %vm1111_vm1, %v3913_v14  ;;  %3755 = vmatmul.mubr.msk.bf16.gmra.mxu1 %vm1111_vm1, %v3914_v15  ;;  %v3970_v7 = vld [vmem:[%s6261_s0 + $0x368] sm:$0xff]   ;;  %v3972_v9 = vld [vmem:[%s6261_s0 + $0x370] sm:$0xff]   ;;  %v3974_v11 = vld [vmem:[%s6261_s0 + $0x378] sm:$0xff]  }
  0x33   :  { %3606 = vmatprep.mubr.msk.bf16.mxu0 %vm1111_vm1, %v3915_v16  ;;  %3758 = vmatprep.mubr.msk.bf16.mxu1 %vm1111_vm1, %v3916_v17  ;;  %v3975_v12 = vld [vmem:[%s6261_s0 + $0x120] sm:$0xff]   ;;  %v3977_v14 = vld [vmem:[%s6261_s0 + $0x128] sm:$0xff]   ;;  %v3979_v16 = vld [vmem:[%s6261_s0 + $0x130] sm:$0xff]  }
  0x34   :  { %v3976_v13 = vld [vmem:[%s6261_s0 + $0x380] sm:$0xff]   ;;  %v3978_v15 = vld [vmem:[%s6261_s0 + $0x388] sm:$0xff]   ;;  %v3980_v17 = vld [vmem:[%s6261_s0 + $0x390] sm:$0xff]  }
  0x3a   :  { %3607 = vmatmul.mubr.msk.bf16.gmra.mxu0 %vm1111_vm1, %v3917_v18  ;;  %3759 = vmatmul.mubr.msk.bf16.gmra.mxu1 %vm1111_vm1, %v3918_v19  ;;  %v3981_v18 = vld [vmem:[%s6261_s0 + $0x138] sm:$0xff]  }
  0x3b   :  { %3610 = vmatprep.mubr.msk.bf16.mxu0 %vm1111_vm1, %v3919_v20  ;;  %3762 = vmatprep.mubr.msk.bf16.mxu1 %vm1111_vm1, %v3920_v21  ;;  %v3982_v19 = vld [vmem:[%s6261_s0 + $0x398] sm:$0xff]   ;;  %v3983_v20 = vld [vmem:[%s6261_s0 + $0x140] sm:$0xff]  }
  0x3c   :  { %v3984_v21 = vld [vmem:[%s6261_s0 + $0x3a0] sm:$0xff]  }
  0x42   :  { %3611 = vmatmul.mubr.msk.bf16.gmra.mxu0 %vm1111_vm1, %v3921_v22  ;;  %3763 = vmatmul.mubr.msk.bf16.gmra.mxu1 %vm1111_vm1, %v3922_v23  ;;  %v3985_v22 = vld [vmem:[%s6261_s0 + $0x148] sm:$0xff]  }
  0x43   :  { %3614 = vmatprep.mubr.msk.bf16.mxu0 %vm1111_vm1, %v3923_v24  ;;  %3766 = vmatprep.mubr.msk.bf16.mxu1 %vm1111_vm1, %v3924_v25  ;;  %v3986_v23 = vld [vmem:[%s6261_s0 + $0x3a8] sm:$0xff]   ;;  %v3987_v24 = vld [vmem:[%s6261_s0 + $0x150] sm:$0xff]  }
  0x44   :  { %v3988_v25 = vld [vmem:[%s6261_s0 + $0x3b0] sm:$0xff]  }
  0x4a   :  { %3615 = vmatmul.mubr.msk.bf16.gmra.mxu0 %vm1111_vm1, %v3925_v26  ;;  %3767 = vmatmul.mubr.msk.bf16.gmra.mxu1 %vm1111_vm1, %v3926_v27  ;;  %v3989_v26 = vld [vmem:[%s6261_s0 + $0x158] sm:$0xff]  }
  0x4b   :  { %3618 = vmatprep.mubr.msk.bf16.mxu0 %vm1111_vm1, %v3927_v28  ;;  %3770 = vmatprep.mubr.msk.bf16.mxu1 %vm1111_vm1, %v3928_v29  ;;  %v3990_v27 = vld [vmem:[%s6261_s0 + $0x3b8] sm:$0xff]   ;;  %v3991_v28 = vld [vmem:[%s6261_s0 + $0x160] sm:$0xff]  }
  0x4c   :  { %v3992_v29 = vld [vmem:[%s6261_s0 + $0x3c0] sm:$0xff]  }
  0x52   :  { %3619 = vmatmul.mubr.msk.bf16.gmra.mxu0 %vm1111_vm1, %v3929_v30  ;;  %3771 = vmatmul.mubr.msk.bf16.gmra.mxu1 %vm1111_vm1, %v3930_v31  ;;  %v3993_v30 = vld [vmem:[%s6261_s0 + $0x168] sm:$0xff]  }
  0x53   :  { %3622 = vmatprep.mubr.msk.bf16.mxu0 %vm1111_vm1, %v3931_v32  ;;  %3774 = vmatprep.mubr.msk.bf16.mxu1 %vm1111_vm1, %v3932_v33  ;;  %v3994_v31 = vld [vmem:[%s6261_s0 + $0x3c8] sm:$0xff]   ;;  %v3995_v32 = vld [vmem:[%s6261_s0 + $0x170] sm:$0xff]  }
  0x54   :  { %v3996_v33 = vld [vmem:[%s6261_s0 + $0x3d0] sm:$0xff]  }
  0x5a   :  { %3623 = vmatmul.mubr.msk.bf16.gmra.mxu0 %vm1111_vm1, %v3933_v34  ;;  %3775 = vmatmul.mubr.msk.bf16.gmra.mxu1 %vm1111_vm1, %v3934_v35  ;;  %v3997_v34 = vld [vmem:[%s6261_s0 + $0x178] sm:$0xff]  }
  0x5b   :  { %3626 = vmatprep.mubr.msk.bf16.mxu0 %vm1111_vm1, %v3935_v36  ;;  %3778 = vmatprep.mubr.msk.bf16.mxu1 %vm1111_vm1, %v3936_v37  ;;  %v3998_v35 = vld [vmem:[%s6261_s0 + $0x3d8] sm:$0xff]   ;;  %v3999_v36 = vld [vmem:[%s6261_s0 + $0x180] sm:$0xff]  }
  0x5c   :  { %v4000_v37 = vld [vmem:[%s6261_s0 + $0x3e0] sm:$0xff]  }
  0x62   :  { %3627 = vmatmul.mubr.msk.bf16.gmra.mxu0 %vm1111_vm1, %v3937_v38  ;;  %3779 = vmatmul.mubr.msk.bf16.gmra.mxu1 %vm1111_vm1, %v3938_v39  ;;  %v4001_v38 = vld [vmem:[%s6261_s0 + $0x188] sm:$0xff]  }
  0x63   :  { %3630 = vmatprep.mubr.msk.bf16.mxu0 %vm1111_vm1, %v3939_v40  ;;  %3782 = vmatprep.mubr.msk.bf16.mxu1 %vm1111_vm1, %v3940_v41  ;;  %v4002_v39 = vld [vmem:[%s6261_s0 + $0x3e8] sm:$0xff]   ;;  %v4003_v40 = vld [vmem:[%s6261_s0 + $0x190] sm:$0xff]  }
  0x64   :  { %v4004_v41 = vld [vmem:[%s6261_s0 + $0x3f0] sm:$0xff]  }
  0x6a   :  { %3631 = vmatmul.mubr.msk.bf16.gmra.mxu0 %vm1111_vm1, %v3941_v42  ;;  %3783 = vmatmul.mubr.msk.bf16.gmra.mxu1 %vm1111_vm1, %v3942_v43  ;;  %v4533_v42 = vld [vmem:[#allocation4] ss:$0 sm:$0xff] }
  0x6b   :  { %3634 = vmatprep.mubr.msk.bf16.mxu0 %vm1111_vm1, %v3943_v44  ;;  %3786 = vmatprep.mubr.msk.bf16.mxu1 %vm1111_vm1, %v3944_v45 }
  0x72   :  { %3635 = vmatmul.mubr.msk.bf16.gmra.mxu0 %vm1111_vm1, %v3945_v46  ;;  %3787 = vmatmul.mubr.msk.bf16.gmra.mxu1 %vm1111_vm1, %v3946_v47 }
  0x73   :  { %3638 = vmatprep.mubr.msk.bf16.mxu0 %vm1111_vm1, %v3947_v48  ;;  %3790 = vmatprep.mubr.msk.bf16.mxu1 %vm1111_vm1, %v3948_v49 }
  0x7a   :  { %3639 = vmatmul.mubr.msk.bf16.gmra.mxu0 %vm1111_vm1, %v3949_v50  ;;  %3791 = vmatmul.mubr.msk.bf16.gmra.mxu1 %vm1111_vm1, %v3950_v51 }
  0x7b   :  { %3642 = vmatprep.mubr.msk.bf16.mxu0 %vm1111_vm1, %v3951_v52  ;;  %3794 = vmatprep.mubr.msk.bf16.mxu1 %vm1111_vm1, %v3952_v53  ;;  %v4005_v53 = vld [vmem:[%s6261_s0 + $0x198] sm:$0xff]  }
  0x82   :  { %3643 = vmatmul.mubr.msk.bf16.gmra.mxu0 %vm1111_vm1, %v3953_v54  ;;  %3795 = vmatmul.mubr.msk.bf16.gmra.mxu1 %vm1111_vm1, %v3954_v55  ;;  %v4006_v54 = vld [vmem:[%s6261_s0 + $0x3f8] sm:$0xff]  }
  0x83   :  { %3646 = vmatprep.mubr.msk.bf16.mxu0 %vm1111_vm1, %v3955_v56  ;;  %3798 = vmatprep.mubr.msk.bf16.mxu1 %vm1111_vm1, %v3956_v57  ;;  %v4007_v57 = vld [vmem:[%s6261_s0 + $0x1a0] sm:$0xff]  }
  0x8a   :  { %3647 = vmatmul.mubr.msk.bf16.gmra.mxu0 %vm1111_vm1, %v3957_v58  ;;  %3799 = vmatmul.mubr.msk.bf16.gmra.mxu1 %vm1111_vm1, %v3958_v59  ;;  %v4008_v58 = vld [vmem:[%s6261_s0 + $0x400] sm:$0xff]  }
  0x8b   :  { %3650 = vmatprep.mubr.msk.bf16.mxu0 %vm1111_vm1, %v3959_v60  ;;  %3802 = vmatprep.mubr.msk.bf16.mxu1 %vm1111_vm1, %v3960_v61 }
  0x92   :  { %3651 = vmatmul.mubr.msk.bf16.gmra.mxu0 %vm1111_vm1, %v3961_v62  ;;  %3803 = vmatmul.mubr.msk.bf16.gmra.mxu1 %vm1111_vm1, %v3962_v63 }
  0x93   :  { %3654 = vmatprep.mubr.msk.bf16.mxu0 %vm1111_vm1, %v3963_v0  ;;  %3806 = vmatprep.mubr.msk.bf16.mxu1 %vm1111_vm1, %v3964_v1 }
  0x9a   :  { %3655 = vmatmul.mubr.msk.bf16.gmra.mxu0 %vm1111_vm1, %v3965_v2  ;;  %3807 = vmatmul.mubr.msk.bf16.gmra.mxu1 %vm1111_vm1, %v3966_v3 }
  0x9b   :  { %3658 = vmatprep.mubr.msk.bf16.mxu0 %vm1111_vm1, %v3967_v4  ;;  %3810 = vmatprep.mubr.msk.bf16.mxu1 %vm1111_vm1, %v3968_v5 }
  0xa2   :  { %3659 = vmatmul.mubr.msk.bf16.gmra.mxu0 %vm1111_vm1, %v3969_v6  ;;  %3811 = vmatmul.mubr.msk.bf16.gmra.mxu1 %vm1111_vm1, %v3970_v7 }
  0xa3   :  { %3662 = vmatprep.mubr.msk.bf16.mxu0 %vm1111_vm1, %v3971_v8  ;;  %3814 = vmatprep.mubr.msk.bf16.mxu1 %vm1111_vm1, %v3972_v9  ;;  %v4009_v9 = vld [vmem:[%s6261_s0 + $0x1a8] sm:$0xff]  }
  0xaa   :  { %3663 = vmatmul.mubr.msk.bf16.gmra.mxu0 %vm1111_vm1, %v3973_v10  ;;  %3815 = vmatmul.mubr.msk.bf16.gmra.mxu1 %vm1111_vm1, %v3974_v11  ;;  %v4010_v10 = vld [vmem:[%s6261_s0 + $0x408] sm:$0xff]  }
  0xab   :  { %3666 = vmatprep.mubr.msk.bf16.mxu0 %vm1111_vm1, %v3975_v12  ;;  %3818 = vmatprep.mubr.msk.bf16.mxu1 %vm1111_vm1, %v3976_v13  ;;  %v4011_v13 = vld [vmem:[%s6261_s0 + $0x1b0] sm:$0xff]  }
  0xb2   :  { %3667 = vmatmul.mubr.msk.bf16.gmra.mxu0 %vm1111_vm1, %v3977_v14  ;;  %3819 = vmatmul.mubr.msk.bf16.gmra.mxu1 %vm1111_vm1, %v3978_v15  ;;  %v4012_v14 = vld [vmem:[%s6261_s0 + $0x410] sm:$0xff]  }
  0xb3   :  { %3670 = vmatprep.mubr.msk.bf16.mxu0 %vm1111_vm1, %v3979_v16  ;;  %3822 = vmatprep.mubr.msk.bf16.mxu1 %vm1111_vm1, %v3980_v17 }
  0xba   :  { %3671 = vmatmul.mubr.msk.bf16.gmra.mxu0 %vm1111_vm1, %v3981_v18  ;;  %3823 = vmatmul.mubr.msk.bf16.gmra.mxu1 %vm1111_vm1, %v3982_v19 }
  0xbb   :  { %3674 = vmatprep.mubr.msk.bf16.mxu0 %vm1111_vm1, %v3983_v20  ;;  %3826 = vmatprep.mubr.msk.bf16.mxu1 %vm1111_vm1, %v3984_v21 }
  0xc2   :  { %3675 = vmatmul.mubr.msk.bf16.gmra.mxu0 %vm1111_vm1, %v3985_v22  ;;  %3827 = vmatmul.mubr.msk.bf16.gmra.mxu1 %vm1111_vm1, %v3986_v23 }
  0xc3   :  { %3678 = vmatprep.mubr.msk.bf16.mxu0 %vm1111_vm1, %v3987_v24  ;;  %3830 = vmatprep.mubr.msk.bf16.mxu1 %vm1111_vm1, %v3988_v25 }
  0xca   :  { %3679 = vmatmul.mubr.msk.bf16.gmra.mxu0 %vm1111_vm1, %v3989_v26  ;;  %3831 = vmatmul.mubr.msk.bf16.gmra.mxu1 %vm1111_vm1, %v3990_v27 }
  0xcb   :  { %3682 = vmatprep.mubr.msk.bf16.mxu0 %vm1111_vm1, %v3991_v28  ;;  %3834 = vmatprep.mubr.msk.bf16.mxu1 %vm1111_vm1, %v3992_v29  ;;  %v4013_v29 = vld [vmem:[%s6261_s0 + $0x1b8] sm:$0xff]  }
  0xd2   :  { %3683 = vmatmul.mubr.msk.bf16.gmra.mxu0 %vm1111_vm1, %v3993_v30  ;;  %3835 = vmatmul.mubr.msk.bf16.gmra.mxu1 %vm1111_vm1, %v3994_v31  ;;  %v4014_v30 = vld [vmem:[%s6261_s0 + $0x418] sm:$0xff]  }
  0xd3   :  { %3686 = vmatprep.mubr.msk.bf16.mxu0 %vm1111_vm1, %v3995_v32  ;;  %3838 = vmatprep.mubr.msk.bf16.mxu1 %vm1111_vm1, %v3996_v33  ;;  %v4015_v33 = vld [vmem:[%s6261_s0 + $0x1c0] sm:$0xff]  }
  0xda   :  { %3687 = vmatmul.mubr.msk.bf16.gmra.mxu0 %vm1111_vm1, %v3997_v34  ;;  %3839 = vmatmul.mubr.msk.bf16.gmra.mxu1 %vm1111_vm1, %v3998_v35  ;;  %v4016_v34 = vld [vmem:[%s6261_s0 + $0x420] sm:$0xff]  }
  0xdb   :  { %3690 = vmatprep.mubr.msk.bf16.mxu0 %vm1111_vm1, %v3999_v36  ;;  %3842 = vmatprep.mubr.msk.bf16.mxu1 %vm1111_vm1, %v4000_v37 }
  0xe2   :  { %v3596_v43 = vpop.f32.mrf.mxu0  ;;  %3691 = vmatmul.mubr.msk.bf16.gmra.mxu0 %vm1111_vm1, %v4001_v38  ;;  %v3748_v44 = vpop.f32.mrf.mxu1  ;;  %3843 = vmatmul.mubr.msk.bf16.gmra.mxu1 %vm1111_vm1, %v4002_v39 }
  0xe3   :  { %v1617_v45 = vadd.f32 %v3596_v43, %v4533_v42  ;;  %v2225_v46 = vadd.f32 %v3748_v44, %v4533_v42  ;;  %3694 = vmatprep.mubr.msk.bf16.mxu0 %vm1111_vm1, %v4003_v40  ;;  %3846 = vmatprep.mubr.msk.bf16.mxu1 %vm1111_vm1, %v4004_v41 }
  0xe4   :  { %v1608_v47 = vpop.f32.mrf.mxu0  ;;  %v2216_v48 = vpop.f32.mrf.mxu1 }
  0xe5   :  { %2826 = vst.msk [vmem:[%s6264_s3 + $0x10] sm:$0xff] %vm2823_vm2, %v1617_v45  ;;  %2978 = vst.msk [vmem:[%s6264_s3 + $0x4d0] sm:$0xff] %vm2823_vm2, %v2225_v46  ;;  %v1609_v49 = vadd.f32 %v4533_v42, %v1608_v47  ;;  %v2217_v50 = vadd.f32 %v4533_v42, %v2216_v48 }
  0xe6   :  { %v3597_v51 = vpop.f32.mrf.mxu0  ;;  %v3749_v52 = vpop.f32.mrf.mxu1 }
  0xe7   :  { %2824 = vst.msk [vmem:[%s6264_s3] sm:$0xff] %vm2823_vm2, %v1609_v49  ;;  %2976 = vst.msk [vmem:[%s6264_s3 + $0x4c0] sm:$0xff] %vm2823_vm2, %v2217_v50  ;;  %v1620_v55 = vadd.f32 %v3597_v51, %v4533_v42  ;;  %v2228_v56 = vadd.f32 %v3749_v52, %v4533_v42  ;;  %v4017_v50 = vld [vmem:[%s6261_s0 + $0x1c8] sm:$0xff]  }
  0xe8   :  { %v1611_v59 = vpop.f32.mrf.mxu0  ;;  %v2219_v60 = vpop.f32.mrf.mxu1  ;;  %v4018_v51 = vld [vmem:[%s6261_s0 + $0x428] sm:$0xff]  }
  0xe9   :  { %2827 = vst.msk [vmem:[%s6264_s3 + $0x18] sm:$0xff] %vm2823_vm2, %v1620_v55  ;;  %2979 = vst.msk [vmem:[%s6264_s3 + $0x4d8] sm:$0xff] %vm2823_vm2, %v2228_v56  ;;  %v1612_v61 = vadd.f32 %v4533_v42, %v1611_v59  ;;  %v2220_v62 = vadd.f32 %v4533_v42, %v2219_v60  ;;  %v4020_v55 = vld [vmem:[%s6261_s0 + $0x430] sm:$0xff]  }
  0xea   :  { %v3600_v63 = vpop.f32.mrf.mxu0  ;;  %3695 = vmatmul.mubr.msk.bf16.gmra.mxu0 %vm1111_vm1, %v4005_v53  ;;  %v3752_v0 = vpop.f32.mrf.mxu1  ;;  %3847 = vmatmul.mubr.msk.bf16.gmra.mxu1 %vm1111_vm1, %v4006_v54  ;;  %v4019_v54 = vld [vmem:[%s6261_s0 + $0x1d0] sm:$0xff]  }
  0xeb   :  { %2825 = vst.msk [vmem:[%s6264_s3 + $0x8] sm:$0xff] %vm2823_vm2, %v1612_v61  ;;  %2977 = vst.msk [vmem:[%s6264_s3 + $0x4c8] sm:$0xff] %vm2823_vm2, %v2220_v62  ;;  %v1633_v1 = vadd.f32 %v3600_v63, %v4533_v42  ;;  %v2241_v2 = vadd.f32 %v3752_v0, %v4533_v42  ;;  %3698 = vmatprep.mubr.msk.bf16.mxu0 %vm1111_vm1, %v4007_v57  ;;  %3850 = vmatprep.mubr.msk.bf16.mxu1 %vm1111_vm1, %v4008_v58 }
  0xec   :  { %v1624_v3 = vpop.f32.mrf.mxu0  ;;  %v2232_v4 = vpop.f32.mrf.mxu1 }
  0xed   :  { %2830 = vst.msk [vmem:[%s6264_s3 + $0x30] sm:$0xff] %vm2823_vm2, %v1633_v1  ;;  %2982 = vst.msk [vmem:[%s6264_s3 + $0x4f0] sm:$0xff] %vm2823_vm2, %v2241_v2  ;;  %v1625_v5 = vadd.f32 %v4533_v42, %v1624_v3  ;;  %v2233_v6 = vadd.f32 %v4533_v42, %v2232_v4 }
  0xee   :  { %v3601_v7 = vpop.f32.mrf.mxu0  ;;  %v3753_v8 = vpop.f32.mrf.mxu1 }
  0xef   :  { %2828 = vst.msk [vmem:[%s6264_s3 + $0x20] sm:$0xff] %vm2823_vm2, %v1625_v5  ;;  %2980 = vst.msk [vmem:[%s6264_s3 + $0x4e0] sm:$0xff] %vm2823_vm2, %v2233_v6  ;;  %v1636_v11 = vadd.f32 %v3601_v7, %v4533_v42  ;;  %v2244_v12 = vadd.f32 %v3753_v8, %v4533_v42  ;;  %v4021_v6 = vld [vmem:[%s6261_s0 + $0x1d8] sm:$0xff]  }
  0xf0   :  { %v1627_v15 = vpop.f32.mrf.mxu0  ;;  %v2235_v16 = vpop.f32.mrf.mxu1  ;;  %v4022_v7 = vld [vmem:[%s6261_s0 + $0x438] sm:$0xff]  }
  0xf1   :  { %2831 = vst.msk [vmem:[%s6264_s3 + $0x38] sm:$0xff] %vm2823_vm2, %v1636_v11  ;;  %2983 = vst.msk [vmem:[%s6264_s3 + $0x4f8] sm:$0xff] %vm2823_vm2, %v2244_v12  ;;  %v1628_v17 = vadd.f32 %v4533_v42, %v1627_v15  ;;  %v2236_v18 = vadd.f32 %v4533_v42, %v2235_v16  ;;  %v4024_v11 = vld [vmem:[%s6261_s0 + $0x440] sm:$0xff]  }
  0xf2   :  { %v3604_v19 = vpop.f32.mrf.mxu0  ;;  %3699 = vmatmul.mubr.msk.bf16.gmra.mxu0 %vm1111_vm1, %v4009_v9  ;;  %v3756_v20 = vpop.f32.mrf.mxu1  ;;  %3851 = vmatmul.mubr.msk.bf16.gmra.mxu1 %vm1111_vm1, %v4010_v10  ;;  %v4023_v10 = vld [vmem:[%s6261_s0 + $0x1e0] sm:$0xff]  }
  0xf3   :  { %2829 = vst.msk [vmem:[%s6264_s3 + $0x28] sm:$0xff] %vm2823_vm2, %v1628_v17  ;;  %2981 = vst.msk [vmem:[%s6264_s3 + $0x4e8] sm:$0xff] %vm2823_vm2, %v2236_v18  ;;  %v1649_v21 = vadd.f32 %v3604_v19, %v4533_v42  ;;  %v2257_v22 = vadd.f32 %v3756_v20, %v4533_v42  ;;  %3702 = vmatprep.mubr.msk.bf16.mxu0 %vm1111_vm1, %v4011_v13  ;;  %3854 = vmatprep.mubr.msk.bf16.mxu1 %vm1111_vm1, %v4012_v14 }
  0xf4   :  { %v1640_v23 = vpop.f32.mrf.mxu0  ;;  %v2248_v24 = vpop.f32.mrf.mxu1 }
  0xf5   :  { %2834 = vst.msk [vmem:[%s6264_s3 + $0x50] sm:$0xff] %vm2823_vm2, %v1649_v21  ;;  %2986 = vst.msk [vmem:[%s6264_s3 + $0x510] sm:$0xff] %vm2823_vm2, %v2257_v22  ;;  %v1641_v25 = vadd.f32 %v4533_v42, %v1640_v23  ;;  %v2249_v26 = vadd.f32 %v4533_v42, %v2248_v24 }
  0xf6   :  { %v3605_v27 = vpop.f32.mrf.mxu0  ;;  %v3757_v28 = vpop.f32.mrf.mxu1 }
  0xf7   :  { %2832 = vst.msk [vmem:[%s6264_s3 + $0x40] sm:$0xff] %vm2823_vm2, %v1641_v25  ;;  %2984 = vst.msk [vmem:[%s6264_s3 + $0x500] sm:$0xff] %vm2823_vm2, %v2249_v26  ;;  %v1652_v31 = vadd.f32 %v3605_v27, %v4533_v42  ;;  %v2260_v32 = vadd.f32 %v3757_v28, %v4533_v42  ;;  %v4025_v26 = vld [vmem:[%s6261_s0 + $0x1e8] sm:$0xff]  }
  0xf8   :  { %v1643_v35 = vpop.f32.mrf.mxu0  ;;  %v2251_v36 = vpop.f32.mrf.mxu1  ;;  %v4026_v27 = vld [vmem:[%s6261_s0 + $0x448] sm:$0xff]  }
  0xf9   :  { %2835 = vst.msk [vmem:[%s6264_s3 + $0x58] sm:$0xff] %vm2823_vm2, %v1652_v31  ;;  %2987 = vst.msk [vmem:[%s6264_s3 + $0x518] sm:$0xff] %vm2823_vm2, %v2260_v32  ;;  %v1644_v37 = vadd.f32 %v4533_v42, %v1643_v35  ;;  %v2252_v38 = vadd.f32 %v4533_v42, %v2251_v36  ;;  %v4028_v31 = vld [vmem:[%s6261_s0 + $0x450] sm:$0xff]  }
  0xfa   :  { %v3608_v39 = vpop.f32.mrf.mxu0  ;;  %3703 = vmatmul.mubr.msk.bf16.gmra.mxu0 %vm1111_vm1, %v4013_v29  ;;  %v3760_v40 = vpop.f32.mrf.mxu1  ;;  %3855 = vmatmul.mubr.msk.bf16.gmra.mxu1 %vm1111_vm1, %v4014_v30  ;;  %v4027_v30 = vld [vmem:[%s6261_s0 + $0x1f0] sm:$0xff]  }
  0xfb   :  { %2833 = vst.msk [vmem:[%s6264_s3 + $0x48] sm:$0xff] %vm2823_vm2, %v1644_v37  ;;  %2985 = vst.msk [vmem:[%s6264_s3 + $0x508] sm:$0xff] %vm2823_vm2, %v2252_v38  ;;  %v1665_v41 = vadd.f32 %v3608_v39, %v4533_v42  ;;  %v2273_v43 = vadd.f32 %v3760_v40, %v4533_v42  ;;  %3706 = vmatprep.mubr.msk.bf16.mxu0 %vm1111_vm1, %v4015_v33  ;;  %3858 = vmatprep.mubr.msk.bf16.mxu1 %vm1111_vm1, %v4016_v34 }
  0xfc   :  { %v1656_v44 = vpop.f32.mrf.mxu0  ;;  %v2264_v45 = vpop.f32.mrf.mxu1 }
  0xfd   :  { %2838 = vst.msk [vmem:[%s6264_s3 + $0x70] sm:$0xff] %vm2823_vm2, %v1665_v41  ;;  %2990 = vst.msk [vmem:[%s6264_s3 + $0x530] sm:$0xff] %vm2823_vm2, %v2273_v43  ;;  %v1657_v46 = vadd.f32 %v4533_v42, %v1656_v44  ;;  %v2265_v47 = vadd.f32 %v4533_v42, %v2264_v45 }
  0xfe   :  { %v3609_v48 = vpop.f32.mrf.mxu0  ;;  %v3761_v49 = vpop.f32.mrf.mxu1 }
  0xff   :  { %2836 = vst.msk [vmem:[%s6264_s3 + $0x60] sm:$0xff] %vm2823_vm2, %v1657_v46  ;;  %2988 = vst.msk [vmem:[%s6264_s3 + $0x520] sm:$0xff] %vm2823_vm2, %v2265_v47  ;;  %v1668_v52 = vadd.f32 %v3609_v48, %v4533_v42  ;;  %v2276_v53 = vadd.f32 %v3761_v49, %v4533_v42  ;;  %v4029_v47 = vld [vmem:[%s6261_s0 + $0x1f8] sm:$0xff]  }
 0x100   :  { %v1659_v56 = vpop.f32.mrf.mxu0  ;;  %v2267_v57 = vpop.f32.mrf.mxu1  ;;  %v4030_v48 = vld [vmem:[%s6261_s0 + $0x458] sm:$0xff]  }
 0x101   :  { %2839 = vst.msk [vmem:[%s6264_s3 + $0x78] sm:$0xff] %vm2823_vm2, %v1668_v52  ;;  %2991 = vst.msk [vmem:[%s6264_s3 + $0x538] sm:$0xff] %vm2823_vm2, %v2276_v53  ;;  %v1660_v58 = vadd.f32 %v4533_v42, %v1659_v56  ;;  %v2268_v59 = vadd.f32 %v4533_v42, %v2267_v57  ;;  %v4032_v52 = vld [vmem:[%s6261_s0 + $0x460] sm:$0xff]  }
 0x102   :  { %v3612_v60 = vpop.f32.mrf.mxu0  ;;  %3707 = vmatmul.mubr.msk.bf16.gmra.mxu0 %vm1111_vm1, %v4017_v50  ;;  %v3764_v61 = vpop.f32.mrf.mxu1  ;;  %3859 = vmatmul.mubr.msk.bf16.gmra.mxu1 %vm1111_vm1, %v4018_v51  ;;  %v4031_v51 = vld [vmem:[%s6261_s0 + $0x200] sm:$0xff]  }
 0x103   :  { %2837 = vst.msk [vmem:[%s6264_s3 + $0x68] sm:$0xff] %vm2823_vm2, %v1660_v58  ;;  %2989 = vst.msk [vmem:[%s6264_s3 + $0x528] sm:$0xff] %vm2823_vm2, %v2268_v59  ;;  %v1681_v62 = vadd.f32 %v3612_v60, %v4533_v42  ;;  %v2289_v63 = vadd.f32 %v3764_v61, %v4533_v42  ;;  %3710 = vmatprep.mubr.msk.bf16.mxu0 %vm1111_vm1, %v4019_v54  ;;  %3862 = vmatprep.mubr.msk.bf16.mxu1 %vm1111_vm1, %v4020_v55 }
 0x104   :  { %v1672_v0 = vpop.f32.mrf.mxu0  ;;  %v2280_v1 = vpop.f32.mrf.mxu1 }
 0x105   :  { %2842 = vst.msk [vmem:[%s6264_s3 + $0x90] sm:$0xff] %vm2823_vm2, %v1681_v62  ;;  %2994 = vst.msk [vmem:[%s6264_s3 + $0x550] sm:$0xff] %vm2823_vm2, %v2289_v63  ;;  %v1673_v2 = vadd.f32 %v4533_v42, %v1672_v0  ;;  %v2281_v3 = vadd.f32 %v4533_v42, %v2280_v1 }
 0x106   :  { %v3613_v4 = vpop.f32.mrf.mxu0  ;;  %v3765_v5 = vpop.f32.mrf.mxu1 }
 0x107   :  { %2840 = vst.msk [vmem:[%s6264_s3 + $0x80] sm:$0xff] %vm2823_vm2, %v1673_v2  ;;  %2992 = vst.msk [vmem:[%s6264_s3 + $0x540] sm:$0xff] %vm2823_vm2, %v2281_v3  ;;  %v1684_v8 = vadd.f32 %v3613_v4, %v4533_v42  ;;  %v2292_v9 = vadd.f32 %v3765_v5, %v4533_v42  ;;  %v4033_v3 = vld [vmem:[%s6261_s0 + $0x208] sm:$0xff]  }
 0x108   :  { %v1675_v12 = vpop.f32.mrf.mxu0  ;;  %v2283_v13 = vpop.f32.mrf.mxu1  ;;  %v4034_v4 = vld [vmem:[%s6261_s0 + $0x468] sm:$0xff]  }
 0x109   :  { %2843 = vst.msk [vmem:[%s6264_s3 + $0x98] sm:$0xff] %vm2823_vm2, %v1684_v8  ;;  %2995 = vst.msk [vmem:[%s6264_s3 + $0x558] sm:$0xff] %vm2823_vm2, %v2292_v9  ;;  %v1676_v14 = vadd.f32 %v4533_v42, %v1675_v12  ;;  %v2284_v15 = vadd.f32 %v4533_v42, %v2283_v13  ;;  %v4036_v8 = vld [vmem:[%s6261_s0 + $0x470] sm:$0xff]  }
 0x10a   :  { %v3616_v16 = vpop.f32.mrf.mxu0  ;;  %3711 = vmatmul.mubr.msk.bf16.gmra.mxu0 %vm1111_vm1, %v4021_v6  ;;  %v3768_v17 = vpop.f32.mrf.mxu1  ;;  %3863 = vmatmul.mubr.msk.bf16.gmra.mxu1 %vm1111_vm1, %v4022_v7  ;;  %v4035_v7 = vld [vmem:[%s6261_s0 + $0x210] sm:$0xff]  }
 0x10b   :  { %2841 = vst.msk [vmem:[%s6264_s3 + $0x88] sm:$0xff] %vm2823_vm2, %v1676_v14  ;;  %2993 = vst.msk [vmem:[%s6264_s3 + $0x548] sm:$0xff] %vm2823_vm2, %v2284_v15  ;;  %v1697_v18 = vadd.f32 %v3616_v16, %v4533_v42  ;;  %v2305_v19 = vadd.f32 %v3768_v17, %v4533_v42  ;;  %3714 = vmatprep.mubr.msk.bf16.mxu0 %vm1111_vm1, %v4023_v10  ;;  %3866 = vmatprep.mubr.msk.bf16.mxu1 %vm1111_vm1, %v4024_v11 }
 0x10c   :  { %v1688_v20 = vpop.f32.mrf.mxu0  ;;  %v2296_v21 = vpop.f32.mrf.mxu1 }
 0x10d   :  { %2846 = vst.msk [vmem:[%s6264_s3 + $0xb0] sm:$0xff] %vm2823_vm2, %v1697_v18  ;;  %2998 = vst.msk [vmem:[%s6264_s3 + $0x570] sm:$0xff] %vm2823_vm2, %v2305_v19  ;;  %v1689_v22 = vadd.f32 %v4533_v42, %v1688_v20  ;;  %v2297_v23 = vadd.f32 %v4533_v42, %v2296_v21 }
 0x10e   :  { %v3617_v24 = vpop.f32.mrf.mxu0  ;;  %v3769_v25 = vpop.f32.mrf.mxu1 }
 0x10f   :  { %2844 = vst.msk [vmem:[%s6264_s3 + $0xa0] sm:$0xff] %vm2823_vm2, %v1689_v22  ;;  %2996 = vst.msk [vmem:[%s6264_s3 + $0x560] sm:$0xff] %vm2823_vm2, %v2297_v23  ;;  %v1700_v28 = vadd.f32 %v3617_v24, %v4533_v42  ;;  %v2308_v29 = vadd.f32 %v3769_v25, %v4533_v42  ;;  %v4037_v23 = vld [vmem:[%s6261_s0 + $0x218] sm:$0xff]  }
 0x110   :  { %v1691_v32 = vpop.f32.mrf.mxu0  ;;  %v2299_v33 = vpop.f32.mrf.mxu1  ;;  %v4038_v24 = vld [vmem:[%s6261_s0 + $0x478] sm:$0xff]  }
 0x111   :  { %2847 = vst.msk [vmem:[%s6264_s3 + $0xb8] sm:$0xff] %vm2823_vm2, %v1700_v28  ;;  %2999 = vst.msk [vmem:[%s6264_s3 + $0x578] sm:$0xff] %vm2823_vm2, %v2308_v29  ;;  %v1692_v34 = vadd.f32 %v4533_v42, %v1691_v32  ;;  %v2300_v35 = vadd.f32 %v4533_v42, %v2299_v33  ;;  %v4040_v28 = vld [vmem:[%s6261_s0 + $0x480] sm:$0xff]  }
 0x112   :  { %v3620_v36 = vpop.f32.mrf.mxu0  ;;  %3715 = vmatmul.mubr.msk.bf16.gmra.mxu0 %vm1111_vm1, %v4025_v26  ;;  %v3772_v37 = vpop.f32.mrf.mxu1  ;;  %3867 = vmatmul.mubr.msk.bf16.gmra.mxu1 %vm1111_vm1, %v4026_v27  ;;  %v4039_v27 = vld [vmem:[%s6261_s0 + $0x220] sm:$0xff]  }
 0x113   :  { %2845 = vst.msk [vmem:[%s6264_s3 + $0xa8] sm:$0xff] %vm2823_vm2, %v1692_v34  ;;  %2997 = vst.msk [vmem:[%s6264_s3 + $0x568] sm:$0xff] %vm2823_vm2, %v2300_v35  ;;  %v1713_v38 = vadd.f32 %v3620_v36, %v4533_v42  ;;  %v2321_v39 = vadd.f32 %v3772_v37, %v4533_v42  ;;  %3718 = vmatprep.mubr.msk.bf16.mxu0 %vm1111_vm1, %v4027_v30  ;;  %3870 = vmatprep.mubr.msk.bf16.mxu1 %vm1111_vm1, %v4028_v31 }
 0x114   :  { %v1704_v40 = vpop.f32.mrf.mxu0  ;;  %v2312_v41 = vpop.f32.mrf.mxu1 }
 0x115   :  { %2850 = vst.msk [vmem:[%s6264_s3 + $0xd0] sm:$0xff] %vm2823_vm2, %v1713_v38  ;;  %3002 = vst.msk [vmem:[%s6264_s3 + $0x590] sm:$0xff] %vm2823_vm2, %v2321_v39  ;;  %v1705_v43 = vadd.f32 %v4533_v42, %v1704_v40  ;;  %v2313_v44 = vadd.f32 %v4533_v42, %v2312_v41 }
 0x116   :  { %v3621_v45 = vpop.f32.mrf.mxu0  ;;  %v3773_v46 = vpop.f32.mrf.mxu1 }
 0x117   :  { %2848 = vst.msk [vmem:[%s6264_s3 + $0xc0] sm:$0xff] %vm2823_vm2, %v1705_v43  ;;  %3000 = vst.msk [vmem:[%s6264_s3 + $0x580] sm:$0xff] %vm2823_vm2, %v2313_v44  ;;  %v1716_v49 = vadd.f32 %v3621_v45, %v4533_v42  ;;  %v2324_v50 = vadd.f32 %v3773_v46, %v4533_v42  ;;  %v4041_v44 = vld [vmem:[%s6261_s0 + $0x228] sm:$0xff]  }
 0x118   :  { %v1707_v53 = vpop.f32.mrf.mxu0  ;;  %v2315_v54 = vpop.f32.mrf.mxu1  ;;  %v4042_v45 = vld [vmem:[%s6261_s0 + $0x488] sm:$0xff]  }
 0x119   :  { %2851 = vst.msk [vmem:[%s6264_s3 + $0xd8] sm:$0xff] %vm2823_vm2, %v1716_v49  ;;  %3003 = vst.msk [vmem:[%s6264_s3 + $0x598] sm:$0xff] %vm2823_vm2, %v2324_v50  ;;  %v1708_v55 = vadd.f32 %v4533_v42, %v1707_v53  ;;  %v2316_v56 = vadd.f32 %v4533_v42, %v2315_v54  ;;  %v4044_v49 = vld [vmem:[%s6261_s0 + $0x490] sm:$0xff]  }
 0x11a   :  { %v3624_v57 = vpop.f32.mrf.mxu0  ;;  %3719 = vmatmul.mubr.msk.bf16.gmra.mxu0 %vm1111_vm1, %v4029_v47  ;;  %v3776_v58 = vpop.f32.mrf.mxu1  ;;  %3871 = vmatmul.mubr.msk.bf16.gmra.mxu1 %vm1111_vm1, %v4030_v48  ;;  %v4043_v48 = vld [vmem:[%s6261_s0 + $0x230] sm:$0xff]  }
 0x11b   :  { %2849 = vst.msk [vmem:[%s6264_s3 + $0xc8] sm:$0xff] %vm2823_vm2, %v1708_v55  ;;  %3001 = vst.msk [vmem:[%s6264_s3 + $0x588] sm:$0xff] %vm2823_vm2, %v2316_v56  ;;  %v1729_v59 = vadd.f32 %v3624_v57, %v4533_v42  ;;  %v2337_v60 = vadd.f32 %v3776_v58, %v4533_v42  ;;  %3722 = vmatprep.mubr.msk.bf16.mxu0 %vm1111_vm1, %v4031_v51  ;;  %3874 = vmatprep.mubr.msk.bf16.mxu1 %vm1111_vm1, %v4032_v52 }
 0x11c   :  { %v1720_v61 = vpop.f32.mrf.mxu0  ;;  %v2328_v62 = vpop.f32.mrf.mxu1 }
 0x11d   :  { %2854 = vst.msk [vmem:[%s6264_s3 + $0xf0] sm:$0xff] %vm2823_vm2, %v1729_v59  ;;  %3006 = vst.msk [vmem:[%s6264_s3 + $0x5b0] sm:$0xff] %vm2823_vm2, %v2337_v60  ;;  %v1721_v63 = vadd.f32 %v4533_v42, %v1720_v61  ;;  %v2329_v0 = vadd.f32 %v4533_v42, %v2328_v62 }
 0x11e   :  { %v3625_v1 = vpop.f32.mrf.mxu0  ;;  %v3777_v2 = vpop.f32.mrf.mxu1 }
 0x11f   :  { %2852 = vst.msk [vmem:[%s6264_s3 + $0xe0] sm:$0xff] %vm2823_vm2, %v1721_v63  ;;  %3004 = vst.msk [vmem:[%s6264_s3 + $0x5a0] sm:$0xff] %vm2823_vm2, %v2329_v0  ;;  %v1732_v5 = vadd.f32 %v3625_v1, %v4533_v42  ;;  %v2340_v6 = vadd.f32 %v3777_v2, %v4533_v42  ;;  %v4045_v0 = vld [vmem:[%s6261_s0 + $0x238] sm:$0xff]  }
 0x120   :  { %v1723_v9 = vpop.f32.mrf.mxu0  ;;  %v2331_v10 = vpop.f32.mrf.mxu1  ;;  %v4046_v1 = vld [vmem:[%s6261_s0 + $0x498] sm:$0xff]  }
 0x121   :  { %2855 = vst.msk [vmem:[%s6264_s3 + $0xf8] sm:$0xff] %vm2823_vm2, %v1732_v5  ;;  %3007 = vst.msk [vmem:[%s6264_s3 + $0x5b8] sm:$0xff] %vm2823_vm2, %v2340_v6  ;;  %v1724_v11 = vadd.f32 %v4533_v42, %v1723_v9  ;;  %v2332_v12 = vadd.f32 %v4533_v42, %v2331_v10  ;;  %v4048_v5 = vld [vmem:[%s6261_s0 + $0x4a0] sm:$0xff]  }
 0x122   :  { %v3628_v13 = vpop.f32.mrf.mxu0  ;;  %3723 = vmatmul.mubr.msk.bf16.gmra.mxu0 %vm1111_vm1, %v4033_v3  ;;  %v3780_v14 = vpop.f32.mrf.mxu1  ;;  %3875 = vmatmul.mubr.msk.bf16.gmra.mxu1 %vm1111_vm1, %v4034_v4  ;;  %v4047_v4 = vld [vmem:[%s6261_s0 + $0x240] sm:$0xff]  }
 0x123   :  { %2853 = vst.msk [vmem:[%s6264_s3 + $0xe8] sm:$0xff] %vm2823_vm2, %v1724_v11  ;;  %3005 = vst.msk [vmem:[%s6264_s3 + $0x5a8] sm:$0xff] %vm2823_vm2, %v2332_v12  ;;  %v1745_v15 = vadd.f32 %v3628_v13, %v4533_v42  ;;  %v2353_v16 = vadd.f32 %v3780_v14, %v4533_v42  ;;  %3726 = vmatprep.mubr.msk.bf16.mxu0 %vm1111_vm1, %v4035_v7  ;;  %3878 = vmatprep.mubr.msk.bf16.mxu1 %vm1111_vm1, %v4036_v8 }
 0x124   :  { %v1736_v17 = vpop.f32.mrf.mxu0  ;;  %v2344_v18 = vpop.f32.mrf.mxu1 }
 0x125   :  { %2858 = vst.msk [vmem:[%s6264_s3 + $0x110] sm:$0xff] %vm2823_vm2, %v1745_v15  ;;  %3010 = vst.msk [vmem:[%s6264_s3 + $0x5d0] sm:$0xff] %vm2823_vm2, %v2353_v16  ;;  %v1737_v19 = vadd.f32 %v4533_v42, %v1736_v17  ;;  %v2345_v20 = vadd.f32 %v4533_v42, %v2344_v18 }
 0x126   :  { %v3629_v21 = vpop.f32.mrf.mxu0  ;;  %v3781_v22 = vpop.f32.mrf.mxu1 }
 0x127   :  { %2856 = vst.msk [vmem:[%s6264_s3 + $0x100] sm:$0xff] %vm2823_vm2, %v1737_v19  ;;  %3008 = vst.msk [vmem:[%s6264_s3 + $0x5c0] sm:$0xff] %vm2823_vm2, %v2345_v20  ;;  %v1748_v25 = vadd.f32 %v3629_v21, %v4533_v42  ;;  %v2356_v26 = vadd.f32 %v3781_v22, %v4533_v42  ;;  %v4049_v20 = vld [vmem:[%s6261_s0 + $0x248] sm:$0xff]  }
 0x128   :  { %v1739_v29 = vpop.f32.mrf.mxu0  ;;  %v2347_v30 = vpop.f32.mrf.mxu1  ;;  %v4050_v21 = vld [vmem:[%s6261_s0 + $0x4a8] sm:$0xff]  }
 0x129   :  { %2859 = vst.msk [vmem:[%s6264_s3 + $0x118] sm:$0xff] %vm2823_vm2, %v1748_v25  ;;  %3011 = vst.msk [vmem:[%s6264_s3 + $0x5d8] sm:$0xff] %vm2823_vm2, %v2356_v26  ;;  %v1740_v31 = vadd.f32 %v4533_v42, %v1739_v29  ;;  %v2348_v32 = vadd.f32 %v4533_v42, %v2347_v30  ;;  %v4052_v25 = vld [vmem:[%s6261_s0 + $0x4b0] sm:$0xff]  }
 0x12a   :  { %v3632_v33 = vpop.f32.mrf.mxu0  ;;  %3727 = vmatmul.mubr.msk.bf16.gmra.mxu0 %vm1111_vm1, %v4037_v23  ;;  %v3784_v34 = vpop.f32.mrf.mxu1  ;;  %3879 = vmatmul.mubr.msk.bf16.gmra.mxu1 %vm1111_vm1, %v4038_v24  ;;  %v4051_v24 = vld [vmem:[%s6261_s0 + $0x250] sm:$0xff]  }
 0x12b   :  { %2857 = vst.msk [vmem:[%s6264_s3 + $0x108] sm:$0xff] %vm2823_vm2, %v1740_v31  ;;  %3009 = vst.msk [vmem:[%s6264_s3 + $0x5c8] sm:$0xff] %vm2823_vm2, %v2348_v32  ;;  %v1761_v35 = vadd.f32 %v3632_v33, %v4533_v42  ;;  %v2369_v36 = vadd.f32 %v3784_v34, %v4533_v42  ;;  %3730 = vmatprep.mubr.msk.bf16.mxu0 %vm1111_vm1, %v4039_v27  ;;  %3882 = vmatprep.mubr.msk.bf16.mxu1 %vm1111_vm1, %v4040_v28 }
 0x12c   :  { %v1752_v37 = vpop.f32.mrf.mxu0  ;;  %v2360_v38 = vpop.f32.mrf.mxu1 }
 0x12d   :  { %2862 = vst.msk [vmem:[%s6264_s3 + $0x130] sm:$0xff] %vm2823_vm2, %v1761_v35  ;;  %3014 = vst.msk [vmem:[%s6264_s3 + $0x5f0] sm:$0xff] %vm2823_vm2, %v2369_v36  ;;  %v1753_v39 = vadd.f32 %v4533_v42, %v1752_v37  ;;  %v2361_v40 = vadd.f32 %v4533_v42, %v2360_v38 }
 0x12e   :  { %v3633_v41 = vpop.f32.mrf.mxu0  ;;  %v3785_v43 = vpop.f32.mrf.mxu1 }
 0x12f   :  { %2860 = vst.msk [vmem:[%s6264_s3 + $0x120] sm:$0xff] %vm2823_vm2, %v1753_v39  ;;  %3012 = vst.msk [vmem:[%s6264_s3 + $0x5e0] sm:$0xff] %vm2823_vm2, %v2361_v40  ;;  %v1764_v46 = vadd.f32 %v3633_v41, %v4533_v42  ;;  %v2372_v47 = vadd.f32 %v3785_v43, %v4533_v42  ;;  %v4053_v40 = vld [vmem:[%s6261_s0 + $0x258] sm:$0xff]  }
 0x130   :  { %v1755_v50 = vpop.f32.mrf.mxu0  ;;  %v2363_v51 = vpop.f32.mrf.mxu1  ;;  %v4054_v41 = vld [vmem:[%s6261_s0 + $0x4b8] sm:$0xff]  }
 0x131   :  { %2863 = vst.msk [vmem:[%s6264_s3 + $0x138] sm:$0xff] %vm2823_vm2, %v1764_v46  ;;  %3015 = vst.msk [vmem:[%s6264_s3 + $0x5f8] sm:$0xff] %vm2823_vm2, %v2372_v47  ;;  %v1756_v52 = vadd.f32 %v4533_v42, %v1755_v50  ;;  %v2364_v53 = vadd.f32 %v4533_v42, %v2363_v51 }
 0x132   :  { %v3636_v54 = vpop.f32.mrf.mxu0  ;;  %3731 = vmatmul.mubr.msk.bf16.gmra.mxu0 %vm1111_vm1, %v4041_v44  ;;  %v3788_v55 = vpop.f32.mrf.mxu1  ;;  %3883 = vmatmul.mubr.msk.bf16.gmra.mxu1 %vm1111_vm1, %v4042_v45 }
 0x133   :  { %2861 = vst.msk [vmem:[%s6264_s3 + $0x128] sm:$0xff] %vm2823_vm2, %v1756_v52  ;;  %3013 = vst.msk [vmem:[%s6264_s3 + $0x5e8] sm:$0xff] %vm2823_vm2, %v2364_v53  ;;  %v1777_v56 = vadd.f32 %v3636_v54, %v4533_v42  ;;  %v2385_v57 = vadd.f32 %v3788_v55, %v4533_v42  ;;  %3734 = vmatprep.mubr.msk.bf16.mxu0 %vm1111_vm1, %v4043_v48  ;;  %3886 = vmatprep.mubr.msk.bf16.mxu1 %vm1111_vm1, %v4044_v49 }
 0x134   :  { %v1768_v58 = vpop.f32.mrf.mxu0  ;;  %v2376_v59 = vpop.f32.mrf.mxu1 }
 0x135   :  { %2866 = vst.msk [vmem:[%s6264_s3 + $0x150] sm:$0xff] %vm2823_vm2, %v1777_v56  ;;  %3018 = vst.msk [vmem:[%s6264_s3 + $0x610] sm:$0xff] %vm2823_vm2, %v2385_v57  ;;  %v1769_v60 = vadd.f32 %v4533_v42, %v1768_v58  ;;  %v2377_v61 = vadd.f32 %v4533_v42, %v2376_v59 }
 0x136   :  { %v3637_v62 = vpop.f32.mrf.mxu0  ;;  %v3789_v63 = vpop.f32.mrf.mxu1 }
 0x137   :  { %2864 = vst.msk [vmem:[%s6264_s3 + $0x140] sm:$0xff] %vm2823_vm2, %v1769_v60  ;;  %3016 = vst.msk [vmem:[%s6264_s3 + $0x600] sm:$0xff] %vm2823_vm2, %v2377_v61  ;;  %v1780_v2 = vadd.f32 %v3637_v62, %v4533_v42  ;;  %v2388_v3 = vadd.f32 %v3789_v63, %v4533_v42 }
 0x138   :  { %v1771_v6 = vpop.f32.mrf.mxu0  ;;  %v2379_v7 = vpop.f32.mrf.mxu1 }
 0x139   :  { %2867 = vst.msk [vmem:[%s6264_s3 + $0x158] sm:$0xff] %vm2823_vm2, %v1780_v2  ;;  %3019 = vst.msk [vmem:[%s6264_s3 + $0x618] sm:$0xff] %vm2823_vm2, %v2388_v3  ;;  %v1772_v8 = vadd.f32 %v4533_v42, %v1771_v6  ;;  %v2380_v9 = vadd.f32 %v4533_v42, %v2379_v7 }
 0x13a   :  { %v3640_v10 = vpop.f32.mrf.mxu0  ;;  %3735 = vmatmul.mubr.msk.bf16.gmra.mxu0 %vm1111_vm1, %v4045_v0  ;;  %v3792_v11 = vpop.f32.mrf.mxu1  ;;  %3887 = vmatmul.mubr.msk.bf16.gmra.mxu1 %vm1111_vm1, %v4046_v1 }
 0x13b   :  { %2865 = vst.msk [vmem:[%s6264_s3 + $0x148] sm:$0xff] %vm2823_vm2, %v1772_v8  ;;  %3017 = vst.msk [vmem:[%s6264_s3 + $0x608] sm:$0xff] %vm2823_vm2, %v2380_v9  ;;  %v1793_v12 = vadd.f32 %v3640_v10, %v4533_v42  ;;  %v2401_v13 = vadd.f32 %v3792_v11, %v4533_v42  ;;  %3738 = vmatprep.mubr.msk.bf16.mxu0 %vm1111_vm1, %v4047_v4  ;;  %3890 = vmatprep.mubr.msk.bf16.mxu1 %vm1111_vm1, %v4048_v5 }
 0x13c   :  { %v1784_v14 = vpop.f32.mrf.mxu0  ;;  %v2392_v15 = vpop.f32.mrf.mxu1 }
 0x13d   :  { %2870 = vst.msk [vmem:[%s6264_s3 + $0x170] sm:$0xff] %vm2823_vm2, %v1793_v12  ;;  %3022 = vst.msk [vmem:[%s6264_s3 + $0x630] sm:$0xff] %vm2823_vm2, %v2401_v13  ;;  %v1785_v16 = vadd.f32 %v4533_v42, %v1784_v14  ;;  %v2393_v17 = vadd.f32 %v4533_v42, %v2392_v15 }
 0x13e   :  { %v3641_v18 = vpop.f32.mrf.mxu0  ;;  %v3793_v19 = vpop.f32.mrf.mxu1 }
 0x13f   :  { %2868 = vst.msk [vmem:[%s6264_s3 + $0x160] sm:$0xff] %vm2823_vm2, %v1785_v16  ;;  %3020 = vst.msk [vmem:[%s6264_s3 + $0x620] sm:$0xff] %vm2823_vm2, %v2393_v17  ;;  %v1796_v22 = vadd.f32 %v3641_v18, %v4533_v42  ;;  %v2404_v23 = vadd.f32 %v3793_v19, %v4533_v42 }
 0x140   :  { %v1787_v26 = vpop.f32.mrf.mxu0  ;;  %v2395_v27 = vpop.f32.mrf.mxu1 }
 0x141   :  { %2871 = vst.msk [vmem:[%s6264_s3 + $0x178] sm:$0xff] %vm2823_vm2, %v1796_v22  ;;  %3023 = vst.msk [vmem:[%s6264_s3 + $0x638] sm:$0xff] %vm2823_vm2, %v2404_v23  ;;  %v1788_v28 = vadd.f32 %v4533_v42, %v1787_v26  ;;  %v2396_v29 = vadd.f32 %v4533_v42, %v2395_v27 }
 0x142   :  { %v3644_v30 = vpop.f32.mrf.mxu0  ;;  %3739 = vmatmul.mubr.msk.bf16.gmra.mxu0 %vm1111_vm1, %v4049_v20  ;;  %v3796_v31 = vpop.f32.mrf.mxu1  ;;  %3891 = vmatmul.mubr.msk.bf16.gmra.mxu1 %vm1111_vm1, %v4050_v21 }
 0x143   :  { %2869 = vst.msk [vmem:[%s6264_s3 + $0x168] sm:$0xff] %vm2823_vm2, %v1788_v28  ;;  %3021 = vst.msk [vmem:[%s6264_s3 + $0x628] sm:$0xff] %vm2823_vm2, %v2396_v29  ;;  %v1809_v32 = vadd.f32 %v3644_v30, %v4533_v42  ;;  %v2417_v33 = vadd.f32 %v3796_v31, %v4533_v42  ;;  %3742 = vmatprep.mubr.msk.bf16.mxu0 %vm1111_vm1, %v4051_v24  ;;  %3894 = vmatprep.mubr.msk.bf16.mxu1 %vm1111_vm1, %v4052_v25 }
 0x144   :  { %v1800_v34 = vpop.f32.mrf.mxu0  ;;  %v2408_v35 = vpop.f32.mrf.mxu1 }
 0x145   :  { %2874 = vst.msk [vmem:[%s6264_s3 + $0x190] sm:$0xff] %vm2823_vm2, %v1809_v32  ;;  %3026 = vst.msk [vmem:[%s6264_s3 + $0x650] sm:$0xff] %vm2823_vm2, %v2417_v33  ;;  %v1801_v36 = vadd.f32 %v4533_v42, %v1800_v34  ;;  %v2409_v37 = vadd.f32 %v4533_v42, %v2408_v35 }
 0x146   :  { %v3645_v38 = vpop.f32.mrf.mxu0  ;;  %v3797_v39 = vpop.f32.mrf.mxu1 }
 0x147   :  { %2872 = vst.msk [vmem:[%s6264_s3 + $0x180] sm:$0xff] %vm2823_vm2, %v1801_v36  ;;  %3024 = vst.msk [vmem:[%s6264_s3 + $0x640] sm:$0xff] %vm2823_vm2, %v2409_v37  ;;  %v1812_v43 = vadd.f32 %v3645_v38, %v4533_v42  ;;  %v2420_v44 = vadd.f32 %v3797_v39, %v4533_v42 }
 0x148   :  { %v1803_v45 = vpop.f32.mrf.mxu0  ;;  %v2411_v46 = vpop.f32.mrf.mxu1 }
 0x149   :  { %2875 = vst.msk [vmem:[%s6264_s3 + $0x198] sm:$0xff] %vm2823_vm2, %v1812_v43  ;;  %3027 = vst.msk [vmem:[%s6264_s3 + $0x658] sm:$0xff] %vm2823_vm2, %v2420_v44  ;;  %v1804_v47 = vadd.f32 %v4533_v42, %v1803_v45  ;;  %v2412_v48 = vadd.f32 %v4533_v42, %v2411_v46 }
 0x14a   :  { %v3648_v49 = vpop.f32.mrf.mxu0  ;;  %3743 = vmatmul.mubr.msk.bf16.gmra.mxu0 %vm1111_vm1, %v4053_v40  ;;  %v3800_v50 = vpop.f32.mrf.mxu1  ;;  %3895 = vmatmul.mubr.msk.bf16.gmra.mxu1 %vm1111_vm1, %v4054_v41 }
 0x14b   :  { %2873 = vst.msk [vmem:[%s6264_s3 + $0x188] sm:$0xff] %vm2823_vm2, %v1804_v47  ;;  %3025 = vst.msk [vmem:[%s6264_s3 + $0x648] sm:$0xff] %vm2823_vm2, %v2412_v48  ;;  %v1825_v51 = vadd.f32 %v3648_v49, %v4533_v42  ;;  %v2433_v52 = vadd.f32 %v3800_v50, %v4533_v42 }
 0x14c   :  { %v1816_v53 = vpop.f32.mrf.mxu0  ;;  %v2424_v54 = vpop.f32.mrf.mxu1 }
 0x14d   :  { %2878 = vst.msk [vmem:[%s6264_s3 + $0x1b0] sm:$0xff] %vm2823_vm2, %v1825_v51  ;;  %3030 = vst.msk [vmem:[%s6264_s3 + $0x670] sm:$0xff] %vm2823_vm2, %v2433_v52  ;;  %v1817_v55 = vadd.f32 %v4533_v42, %v1816_v53  ;;  %v2425_v56 = vadd.f32 %v4533_v42, %v2424_v54  ;;  %v5419_v52 = vld [vmem:[#allocation4] ss:$0 sm:$0xff] }
 0x14e   :  { %v3649_v57 = vpop.f32.mrf.mxu0  ;;  %v3801_v58 = vpop.f32.mrf.mxu1 }
 0x14f   :  { %2876 = vst.msk [vmem:[%s6264_s3 + $0x1a0] sm:$0xff] %vm2823_vm2, %v1817_v55  ;;  %3028 = vst.msk [vmem:[%s6264_s3 + $0x660] sm:$0xff] %vm2823_vm2, %v2425_v56  ;;  %v1828_v59 = vadd.f32 %v3649_v57, %v4533_v42  ;;  %v2436_v60 = vadd.f32 %v3801_v58, %v4533_v42 }
 0x150   :  { %v1819_v61 = vpop.f32.mrf.mxu0  ;;  %v2427_v62 = vpop.f32.mrf.mxu1 }
 0x151   :  { %2879 = vst.msk [vmem:[%s6264_s3 + $0x1b8] sm:$0xff] %vm2823_vm2, %v1828_v59  ;;  %3031 = vst.msk [vmem:[%s6264_s3 + $0x678] sm:$0xff] %vm2823_vm2, %v2436_v60  ;;  %v1820_v63 = vadd.f32 %v4533_v42, %v1819_v61  ;;  %v2428_v0 = vadd.f32 %v4533_v42, %v2427_v62 }
 0x152   :  { %v3652_v1 = vpop.f32.mrf.mxu0  ;;  %v3804_v2 = vpop.f32.mrf.mxu1 }
 0x153   :  { %2877 = vst.msk [vmem:[%s6264_s3 + $0x1a8] sm:$0xff] %vm2823_vm2, %v1820_v63  ;;  %3029 = vst.msk [vmem:[%s6264_s3 + $0x668] sm:$0xff] %vm2823_vm2, %v2428_v0  ;;  %v1841_v3 = vadd.f32 %v3652_v1, %v4533_v42  ;;  %v2449_v4 = vadd.f32 %v3804_v2, %v4533_v42 }
 0x154   :  { %v1832_v5 = vpop.f32.mrf.mxu0  ;;  %v2440_v6 = vpop.f32.mrf.mxu1 }
 0x155   :  { %2882 = vst.msk [vmem:[%s6264_s3 + $0x1d0] sm:$0xff] %vm2823_vm2, %v1841_v3  ;;  %3034 = vst.msk [vmem:[%s6264_s3 + $0x690] sm:$0xff] %vm2823_vm2, %v2449_v4  ;;  %v1833_v7 = vadd.f32 %v4533_v42, %v1832_v5  ;;  %v2441_v8 = vadd.f32 %v4533_v42, %v2440_v6 }
 0x156   :  { %v3653_v9 = vpop.f32.mrf.mxu0  ;;  %v3805_v10 = vpop.f32.mrf.mxu1 }
 0x157   :  { %2880 = vst.msk [vmem:[%s6264_s3 + $0x1c0] sm:$0xff] %vm2823_vm2, %v1833_v7  ;;  %3032 = vst.msk [vmem:[%s6264_s3 + $0x680] sm:$0xff] %vm2823_vm2, %v2441_v8  ;;  %v1844_v11 = vadd.f32 %v3653_v9, %v4533_v42  ;;  %v2452_v12 = vadd.f32 %v3805_v10, %v4533_v42 }
 0x158   :  { %v1835_v13 = vpop.f32.mrf.mxu0  ;;  %v2443_v14 = vpop.f32.mrf.mxu1 }
 0x159   :  { %2883 = vst.msk [vmem:[%s6264_s3 + $0x1d8] sm:$0xff] %vm2823_vm2, %v1844_v11  ;;  %3035 = vst.msk [vmem:[%s6264_s3 + $0x698] sm:$0xff] %vm2823_vm2, %v2452_v12  ;;  %v1836_v15 = vadd.f32 %v4533_v42, %v1835_v13  ;;  %v2444_v16 = vadd.f32 %v4533_v42, %v2443_v14 }
 0x15a   :  { %v3656_v17 = vpop.f32.mrf.mxu0  ;;  %v3808_v18 = vpop.f32.mrf.mxu1 }
 0x15b   :  { %2881 = vst.msk [vmem:[%s6264_s3 + $0x1c8] sm:$0xff] %vm2823_vm2, %v1836_v15  ;;  %3033 = vst.msk [vmem:[%s6264_s3 + $0x688] sm:$0xff] %vm2823_vm2, %v2444_v16  ;;  %v1857_v19 = vadd.f32 %v3656_v17, %v4533_v42  ;;  %v2465_v20 = vadd.f32 %v3808_v18, %v4533_v42 }
 0x15c   :  { %v1848_v21 = vpop.f32.mrf.mxu0  ;;  %v2456_v22 = vpop.f32.mrf.mxu1 }
 0x15d   :  { %2886 = vst.msk [vmem:[%s6264_s3 + $0x1f0] sm:$0xff] %vm2823_vm2, %v1857_v19  ;;  %3038 = vst.msk [vmem:[%s6264_s3 + $0x6b0] sm:$0xff] %vm2823_vm2, %v2465_v20  ;;  %v1849_v23 = vadd.f32 %v4533_v42, %v1848_v21  ;;  %v2457_v24 = vadd.f32 %v4533_v42, %v2456_v22 }
 0x15e   :  { %v3657_v25 = vpop.f32.mrf.mxu0  ;;  %v3809_v26 = vpop.f32.mrf.mxu1 }
 0x15f   :  { %2884 = vst.msk [vmem:[%s6264_s3 + $0x1e0] sm:$0xff] %vm2823_vm2, %v1849_v23  ;;  %3036 = vst.msk [vmem:[%s6264_s3 + $0x6a0] sm:$0xff] %vm2823_vm2, %v2457_v24  ;;  %v1860_v27 = vadd.f32 %v3657_v25, %v4533_v42  ;;  %v2468_v28 = vadd.f32 %v3809_v26, %v4533_v42 }
 0x160   :  { %v1851_v29 = vpop.f32.mrf.mxu0  ;;  %v2459_v30 = vpop.f32.mrf.mxu1 }
 0x161   :  { %2887 = vst.msk [vmem:[%s6264_s3 + $0x1f8] sm:$0xff] %vm2823_vm2, %v1860_v27  ;;  %3039 = vst.msk [vmem:[%s6264_s3 + $0x6b8] sm:$0xff] %vm2823_vm2, %v2468_v28  ;;  %v1852_v31 = vadd.f32 %v4533_v42, %v1851_v29  ;;  %v2460_v32 = vadd.f32 %v4533_v42, %v2459_v30 }
 0x162   :  { %v3660_v33 = vpop.f32.mrf.mxu0  ;;  %v3812_v34 = vpop.f32.mrf.mxu1 }
 0x163   :  { %2885 = vst.msk [vmem:[%s6264_s3 + $0x1e8] sm:$0xff] %vm2823_vm2, %v1852_v31  ;;  %3037 = vst.msk [vmem:[%s6264_s3 + $0x6a8] sm:$0xff] %vm2823_vm2, %v2460_v32  ;;  %v1873_v35 = vadd.f32 %v3660_v33, %v4533_v42  ;;  %v2481_v36 = vadd.f32 %v3812_v34, %v4533_v42 }
 0x164   :  { %v1864_v37 = vpop.f32.mrf.mxu0  ;;  %v2472_v38 = vpop.f32.mrf.mxu1 }
 0x165   :  { %2890 = vst.msk [vmem:[%s6264_s3 + $0x210] sm:$0xff] %vm2823_vm2, %v1873_v35  ;;  %3042 = vst.msk [vmem:[%s6264_s3 + $0x6d0] sm:$0xff] %vm2823_vm2, %v2481_v36  ;;  %v1865_v39 = vadd.f32 %v4533_v42, %v1864_v37  ;;  %v2473_v40 = vadd.f32 %v4533_v42, %v2472_v38 }
 0x166   :  { %v3661_v41 = vpop.f32.mrf.mxu0  ;;  %v3813_v43 = vpop.f32.mrf.mxu1 }
 0x167   :  { %2888 = vst.msk [vmem:[%s6264_s3 + $0x200] sm:$0xff] %vm2823_vm2, %v1865_v39  ;;  %3040 = vst.msk [vmem:[%s6264_s3 + $0x6c0] sm:$0xff] %vm2823_vm2, %v2473_v40  ;;  %v1876_v44 = vadd.f32 %v3661_v41, %v4533_v42  ;;  %v2484_v45 = vadd.f32 %v3813_v43, %v4533_v42 }
 0x168   :  { %v1867_v46 = vpop.f32.mrf.mxu0  ;;  %v2475_v47 = vpop.f32.mrf.mxu1 }
 0x169   :  { %2891 = vst.msk [vmem:[%s6264_s3 + $0x218] sm:$0xff] %vm2823_vm2, %v1876_v44  ;;  %3043 = vst.msk [vmem:[%s6264_s3 + $0x6d8] sm:$0xff] %vm2823_vm2, %v2484_v45  ;;  %v1868_v48 = vadd.f32 %v4533_v42, %v1867_v46  ;;  %v2476_v49 = vadd.f32 %v4533_v42, %v2475_v47 }
 0x16a   :  { %v3664_v50 = vpop.f32.mrf.mxu0  ;;  %v3816_v51 = vpop.f32.mrf.mxu1 }
 0x16b   :  { %2889 = vst.msk [vmem:[%s6264_s3 + $0x208] sm:$0xff] %vm2823_vm2, %v1868_v48  ;;  %3041 = vst.msk [vmem:[%s6264_s3 + $0x6c8] sm:$0xff] %vm2823_vm2, %v2476_v49  ;;  %v1889_v53 = vadd.f32 %v5419_v52, %v3664_v50  ;;  %v2497_v54 = vadd.f32 %v5419_v52, %v3816_v51 }
 0x16c   :  { %v1880_v55 = vpop.f32.mrf.mxu0  ;;  %v2488_v42 = vpop.f32.mrf.mxu1 }
 0x16d   :  { %2894 = vst.msk [vmem:[%s6264_s3 + $0x230] sm:$0xff] %vm2823_vm2, %v1889_v53  ;;  %3046 = vst.msk [vmem:[%s6264_s3 + $0x6f0] sm:$0xff] %vm2823_vm2, %v2497_v54  ;;  %v1881_v56 = vadd.f32 %v5419_v52, %v1880_v55  ;;  %v2489_v57 = vadd.f32 %v5419_v52, %v2488_v42 }
 0x16e   :  { %v3665_v58 = vpop.f32.mrf.mxu0  ;;  %v3817_v59 = vpop.f32.mrf.mxu1 }
 0x16f   :  { %2892 = vst.msk [vmem:[%s6264_s3 + $0x220] sm:$0xff] %vm2823_vm2, %v1881_v56  ;;  %3044 = vst.msk [vmem:[%s6264_s3 + $0x6e0] sm:$0xff] %vm2823_vm2, %v2489_v57  ;;  %v1892_v60 = vadd.f32 %v5419_v52, %v3665_v58  ;;  %v2500_v61 = vadd.f32 %v5419_v52, %v3817_v59 }
 0x170   :  { %v1883_v62 = vpop.f32.mrf.mxu0  ;;  %v2491_v63 = vpop.f32.mrf.mxu1 }
 0x171   :  { %2895 = vst.msk [vmem:[%s6264_s3 + $0x238] sm:$0xff] %vm2823_vm2, %v1892_v60  ;;  %3047 = vst.msk [vmem:[%s6264_s3 + $0x6f8] sm:$0xff] %vm2823_vm2, %v2500_v61  ;;  %v1884_v0 = vadd.f32 %v5419_v52, %v1883_v62  ;;  %v2492_v1 = vadd.f32 %v5419_v52, %v2491_v63 }
 0x172   :  { %v3668_v2 = vpop.f32.mrf.mxu0  ;;  %v3820_v3 = vpop.f32.mrf.mxu1 }
 0x173   :  { %2893 = vst.msk [vmem:[%s6264_s3 + $0x228] sm:$0xff] %vm2823_vm2, %v1884_v0  ;;  %3045 = vst.msk [vmem:[%s6264_s3 + $0x6e8] sm:$0xff] %vm2823_vm2, %v2492_v1  ;;  %v1905_v4 = vadd.f32 %v5419_v52, %v3668_v2  ;;  %v2513_v5 = vadd.f32 %v5419_v52, %v3820_v3 }
 0x174   :  { %v1896_v6 = vpop.f32.mrf.mxu0  ;;  %v2504_v7 = vpop.f32.mrf.mxu1 }
 0x175   :  { %2898 = vst.msk [vmem:[%s6264_s3 + $0x250] sm:$0xff] %vm2823_vm2, %v1905_v4  ;;  %3050 = vst.msk [vmem:[%s6264_s3 + $0x710] sm:$0xff] %vm2823_vm2, %v2513_v5  ;;  %v1897_v8 = vadd.f32 %v5419_v52, %v1896_v6  ;;  %v2505_v9 = vadd.f32 %v5419_v52, %v2504_v7 }
 0x176   :  { %v3669_v10 = vpop.f32.mrf.mxu0  ;;  %v3821_v11 = vpop.f32.mrf.mxu1 }
 0x177   :  { %2896 = vst.msk [vmem:[%s6264_s3 + $0x240] sm:$0xff] %vm2823_vm2, %v1897_v8  ;;  %3048 = vst.msk [vmem:[%s6264_s3 + $0x700] sm:$0xff] %vm2823_vm2, %v2505_v9  ;;  %v1908_v12 = vadd.f32 %v5419_v52, %v3669_v10  ;;  %v2516_v13 = vadd.f32 %v5419_v52, %v3821_v11 }
 0x178   :  { %v1899_v14 = vpop.f32.mrf.mxu0  ;;  %v2507_v15 = vpop.f32.mrf.mxu1 }
 0x179   :  { %2899 = vst.msk [vmem:[%s6264_s3 + $0x258] sm:$0xff] %vm2823_vm2, %v1908_v12  ;;  %3051 = vst.msk [vmem:[%s6264_s3 + $0x718] sm:$0xff] %vm2823_vm2, %v2516_v13  ;;  %v1900_v16 = vadd.f32 %v5419_v52, %v1899_v14  ;;  %v2508_v17 = vadd.f32 %v5419_v52, %v2507_v15 }
 0x17a   :  { %v3672_v18 = vpop.f32.mrf.mxu0  ;;  %v3824_v19 = vpop.f32.mrf.mxu1 }
 0x17b   :  { %2897 = vst.msk [vmem:[%s6264_s3 + $0x248] sm:$0xff] %vm2823_vm2, %v1900_v16  ;;  %3049 = vst.msk [vmem:[%s6264_s3 + $0x708] sm:$0xff] %vm2823_vm2, %v2508_v17  ;;  %v1921_v20 = vadd.f32 %v5419_v52, %v3672_v18  ;;  %v2529_v21 = vadd.f32 %v5419_v52, %v3824_v19 }
 0x17c   :  { %v1912_v22 = vpop.f32.mrf.mxu0  ;;  %v2520_v23 = vpop.f32.mrf.mxu1 }
 0x17d   :  { %2902 = vst.msk [vmem:[%s6264_s3 + $0x270] sm:$0xff] %vm2823_vm2, %v1921_v20  ;;  %3054 = vst.msk [vmem:[%s6264_s3 + $0x730] sm:$0xff] %vm2823_vm2, %v2529_v21  ;;  %v1913_v24 = vadd.f32 %v5419_v52, %v1912_v22  ;;  %v2521_v25 = vadd.f32 %v5419_v52, %v2520_v23 }
 0x17e   :  { %v3673_v26 = vpop.f32.mrf.mxu0  ;;  %v3825_v27 = vpop.f32.mrf.mxu1 }
 0x17f   :  { %2900 = vst.msk [vmem:[%s6264_s3 + $0x260] sm:$0xff] %vm2823_vm2, %v1913_v24  ;;  %3052 = vst.msk [vmem:[%s6264_s3 + $0x720] sm:$0xff] %vm2823_vm2, %v2521_v25  ;;  %v1924_v28 = vadd.f32 %v5419_v52, %v3673_v26  ;;  %v2532_v29 = vadd.f32 %v5419_v52, %v3825_v27 }
 0x180   :  { %v1915_v30 = vpop.f32.mrf.mxu0  ;;  %v2523_v31 = vpop.f32.mrf.mxu1 }
 0x181   :  { %2903 = vst.msk [vmem:[%s6264_s3 + $0x278] sm:$0xff] %vm2823_vm2, %v1924_v28  ;;  %3055 = vst.msk [vmem:[%s6264_s3 + $0x738] sm:$0xff] %vm2823_vm2, %v2532_v29  ;;  %v1916_v32 = vadd.f32 %v5419_v52, %v1915_v30  ;;  %v2524_v33 = vadd.f32 %v5419_v52, %v2523_v31 }
 0x182   :  { %v3676_v34 = vpop.f32.mrf.mxu0  ;;  %v3828_v35 = vpop.f32.mrf.mxu1 }
 0x183   :  { %2901 = vst.msk [vmem:[%s6264_s3 + $0x268] sm:$0xff] %vm2823_vm2, %v1916_v32  ;;  %3053 = vst.msk [vmem:[%s6264_s3 + $0x728] sm:$0xff] %vm2823_vm2, %v2524_v33  ;;  %v1937_v36 = vadd.f32 %v5419_v52, %v3676_v34  ;;  %v2545_v37 = vadd.f32 %v5419_v52, %v3828_v35 }
 0x184   :  { %v1928_v38 = vpop.f32.mrf.mxu0  ;;  %v2536_v39 = vpop.f32.mrf.mxu1 }
 0x185   :  { %2906 = vst.msk [vmem:[%s6264_s3 + $0x290] sm:$0xff] %vm2823_vm2, %v1937_v36  ;;  %3058 = vst.msk [vmem:[%s6264_s3 + $0x750] sm:$0xff] %vm2823_vm2, %v2545_v37  ;;  %v1929_v40 = vadd.f32 %v5419_v52, %v1928_v38  ;;  %v2537_v41 = vadd.f32 %v5419_v52, %v2536_v39 }
 0x186   :  { %v3677_v43 = vpop.f32.mrf.mxu0  ;;  %v3829_v44 = vpop.f32.mrf.mxu1 }
 0x187   :  { %2904 = vst.msk [vmem:[%s6264_s3 + $0x280] sm:$0xff] %vm2823_vm2, %v1929_v40  ;;  %3056 = vst.msk [vmem:[%s6264_s3 + $0x740] sm:$0xff] %vm2823_vm2, %v2537_v41  ;;  %v1940_v45 = vadd.f32 %v5419_v52, %v3677_v43  ;;  %v2548_v46 = vadd.f32 %v5419_v52, %v3829_v44 }
 0x188   :  { %v1931_v47 = vpop.f32.mrf.mxu0  ;;  %v2539_v48 = vpop.f32.mrf.mxu1 }
 0x189   :  { %2907 = vst.msk [vmem:[%s6264_s3 + $0x298] sm:$0xff] %vm2823_vm2, %v1940_v45  ;;  %3059 = vst.msk [vmem:[%s6264_s3 + $0x758] sm:$0xff] %vm2823_vm2, %v2548_v46  ;;  %v1932_v49 = vadd.f32 %v5419_v52, %v1931_v47  ;;  %v2540_v50 = vadd.f32 %v5419_v52, %v2539_v48 }
 0x18a   :  { %v3680_v51 = vpop.f32.mrf.mxu0  ;;  %v3832_v53 = vpop.f32.mrf.mxu1 }
 0x18b   :  { %2905 = vst.msk [vmem:[%s6264_s3 + $0x288] sm:$0xff] %vm2823_vm2, %v1932_v49  ;;  %3057 = vst.msk [vmem:[%s6264_s3 + $0x748] sm:$0xff] %vm2823_vm2, %v2540_v50  ;;  %v1953_v54 = vadd.f32 %v5419_v52, %v3680_v51  ;;  %v2561_v55 = vadd.f32 %v5419_v52, %v3832_v53 }
 0x18c   :  { %v1944_v42 = vpop.f32.mrf.mxu0  ;;  %v2552_v56 = vpop.f32.mrf.mxu1 }
 0x18d   :  { %2910 = vst.msk [vmem:[%s6264_s3 + $0x2b0] sm:$0xff] %vm2823_vm2, %v1953_v54  ;;  %3062 = vst.msk [vmem:[%s6264_s3 + $0x770] sm:$0xff] %vm2823_vm2, %v2561_v55  ;;  %v1945_v57 = vadd.f32 %v5419_v52, %v1944_v42  ;;  %v2553_v58 = vadd.f32 %v5419_v52, %v2552_v56 }
 0x18e   :  { %v3681_v59 = vpop.f32.mrf.mxu0  ;;  %v3833_v60 = vpop.f32.mrf.mxu1 }
 0x18f   :  { %2908 = vst.msk [vmem:[%s6264_s3 + $0x2a0] sm:$0xff] %vm2823_vm2, %v1945_v57  ;;  %3060 = vst.msk [vmem:[%s6264_s3 + $0x760] sm:$0xff] %vm2823_vm2, %v2553_v58  ;;  %v1956_v61 = vadd.f32 %v5419_v52, %v3681_v59  ;;  %v2564_v62 = vadd.f32 %v5419_v52, %v3833_v60 }
 0x190   :  { %v1947_v63 = vpop.f32.mrf.mxu0  ;;  %v2555_v0 = vpop.f32.mrf.mxu1 }
 0x191   :  { %2911 = vst.msk [vmem:[%s6264_s3 + $0x2b8] sm:$0xff] %vm2823_vm2, %v1956_v61  ;;  %3063 = vst.msk [vmem:[%s6264_s3 + $0x778] sm:$0xff] %vm2823_vm2, %v2564_v62  ;;  %v1948_v1 = vadd.f32 %v5419_v52, %v1947_v63  ;;  %v2556_v2 = vadd.f32 %v5419_v52, %v2555_v0 }
 0x192   :  { %v3684_v3 = vpop.f32.mrf.mxu0  ;;  %v3836_v4 = vpop.f32.mrf.mxu1 }
 0x193   :  { %2909 = vst.msk [vmem:[%s6264_s3 + $0x2a8] sm:$0xff] %vm2823_vm2, %v1948_v1  ;;  %3061 = vst.msk [vmem:[%s6264_s3 + $0x768] sm:$0xff] %vm2823_vm2, %v2556_v2  ;;  %v1969_v5 = vadd.f32 %v5419_v52, %v3684_v3  ;;  %v2577_v6 = vadd.f32 %v5419_v52, %v3836_v4 }
 0x194   :  { %v1960_v7 = vpop.f32.mrf.mxu0  ;;  %v2568_v8 = vpop.f32.mrf.mxu1 }
 0x195   :  { %2914 = vst.msk [vmem:[%s6264_s3 + $0x2d0] sm:$0xff] %vm2823_vm2, %v1969_v5  ;;  %3066 = vst.msk [vmem:[%s6264_s3 + $0x790] sm:$0xff] %vm2823_vm2, %v2577_v6  ;;  %v1961_v9 = vadd.f32 %v5419_v52, %v1960_v7  ;;  %v2569_v10 = vadd.f32 %v5419_v52, %v2568_v8 }
 0x196   :  { %v3685_v11 = vpop.f32.mrf.mxu0  ;;  %v3837_v12 = vpop.f32.mrf.mxu1 }
 0x197   :  { %2912 = vst.msk [vmem:[%s6264_s3 + $0x2c0] sm:$0xff] %vm2823_vm2, %v1961_v9  ;;  %3064 = vst.msk [vmem:[%s6264_s3 + $0x780] sm:$0xff] %vm2823_vm2, %v2569_v10  ;;  %v1972_v13 = vadd.f32 %v5419_v52, %v3685_v11  ;;  %v2580_v14 = vadd.f32 %v5419_v52, %v3837_v12 }
 0x198   :  { %v1963_v15 = vpop.f32.mrf.mxu0  ;;  %v2571_v16 = vpop.f32.mrf.mxu1 }
 0x199   :  { %2915 = vst.msk [vmem:[%s6264_s3 + $0x2d8] sm:$0xff] %vm2823_vm2, %v1972_v13  ;;  %3067 = vst.msk [vmem:[%s6264_s3 + $0x798] sm:$0xff] %vm2823_vm2, %v2580_v14  ;;  %v1964_v17 = vadd.f32 %v5419_v52, %v1963_v15  ;;  %v2572_v18 = vadd.f32 %v5419_v52, %v2571_v16 }
 0x19a   :  { %v3688_v19 = vpop.f32.mrf.mxu0  ;;  %v3840_v20 = vpop.f32.mrf.mxu1 }
 0x19b   :  { %2913 = vst.msk [vmem:[%s6264_s3 + $0x2c8] sm:$0xff] %vm2823_vm2, %v1964_v17  ;;  %3065 = vst.msk [vmem:[%s6264_s3 + $0x788] sm:$0xff] %vm2823_vm2, %v2572_v18  ;;  %v1985_v21 = vadd.f32 %v5419_v52, %v3688_v19  ;;  %v2593_v22 = vadd.f32 %v5419_v52, %v3840_v20 }
 0x19c   :  { %v1976_v23 = vpop.f32.mrf.mxu0  ;;  %v2584_v24 = vpop.f32.mrf.mxu1 }
 0x19d   :  { %2918 = vst.msk [vmem:[%s6264_s3 + $0x2f0] sm:$0xff] %vm2823_vm2, %v1985_v21  ;;  %3070 = vst.msk [vmem:[%s6264_s3 + $0x7b0] sm:$0xff] %vm2823_vm2, %v2593_v22  ;;  %v1977_v25 = vadd.f32 %v5419_v52, %v1976_v23  ;;  %v2585_v26 = vadd.f32 %v5419_v52, %v2584_v24 }
 0x19e   :  { %v3689_v27 = vpop.f32.mrf.mxu0  ;;  %v3841_v28 = vpop.f32.mrf.mxu1 }
 0x19f   :  { %2916 = vst.msk [vmem:[%s6264_s3 + $0x2e0] sm:$0xff] %vm2823_vm2, %v1977_v25  ;;  %3068 = vst.msk [vmem:[%s6264_s3 + $0x7a0] sm:$0xff] %vm2823_vm2, %v2585_v26  ;;  %v1988_v29 = vadd.f32 %v5419_v52, %v3689_v27  ;;  %v2596_v30 = vadd.f32 %v5419_v52, %v3841_v28 }
 0x1a0   :  { %v1979_v31 = vpop.f32.mrf.mxu0  ;;  %v2587_v32 = vpop.f32.mrf.mxu1 }
 0x1a1   :  { %2919 = vst.msk [vmem:[%s6264_s3 + $0x2f8] sm:$0xff] %vm2823_vm2, %v1988_v29  ;;  %3071 = vst.msk [vmem:[%s6264_s3 + $0x7b8] sm:$0xff] %vm2823_vm2, %v2596_v30  ;;  %v1980_v33 = vadd.f32 %v5419_v52, %v1979_v31  ;;  %v2588_v34 = vadd.f32 %v5419_v52, %v2587_v32 }
 0x1a2   :  { %v3692_v35 = vpop.f32.mrf.mxu0  ;;  %v3844_v36 = vpop.f32.mrf.mxu1 }
 0x1a3   :  { %2917 = vst.msk [vmem:[%s6264_s3 + $0x2e8] sm:$0xff] %vm2823_vm2, %v1980_v33  ;;  %3069 = vst.msk [vmem:[%s6264_s3 + $0x7a8] sm:$0xff] %vm2823_vm2, %v2588_v34  ;;  %v2001_v37 = vadd.f32 %v5419_v52, %v3692_v35  ;;  %v2609_v38 = vadd.f32 %v5419_v52, %v3844_v36 }
 0x1a4   :  { %v1992_v39 = vpop.f32.mrf.mxu0  ;;  %v2600_v40 = vpop.f32.mrf.mxu1 }
 0x1a5   :  { %2922 = vst.msk [vmem:[%s6264_s3 + $0x310] sm:$0xff] %vm2823_vm2, %v2001_v37  ;;  %3074 = vst.msk [vmem:[%s6264_s3 + $0x7d0] sm:$0xff] %vm2823_vm2, %v2609_v38  ;;  %v1993_v41 = vadd.f32 %v5419_v52, %v1992_v39  ;;  %v2601_v43 = vadd.f32 %v5419_v52, %v2600_v40 }
 0x1a6   :  { %v3693_v44 = vpop.f32.mrf.mxu0  ;;  %v3845_v45 = vpop.f32.mrf.mxu1 }
 0x1a7   :  { %2920 = vst.msk [vmem:[%s6264_s3 + $0x300] sm:$0xff] %vm2823_vm2, %v1993_v41  ;;  %3072 = vst.msk [vmem:[%s6264_s3 + $0x7c0] sm:$0xff] %vm2823_vm2, %v2601_v43  ;;  %v2004_v46 = vadd.f32 %v5419_v52, %v3693_v44  ;;  %v2612_v47 = vadd.f32 %v5419_v52, %v3845_v45 }
 0x1a8   :  { %v1995_v48 = vpop.f32.mrf.mxu0  ;;  %v2603_v49 = vpop.f32.mrf.mxu1 }
 0x1a9   :  { %2923 = vst.msk [vmem:[%s6264_s3 + $0x318] sm:$0xff] %vm2823_vm2, %v2004_v46  ;;  %3075 = vst.msk [vmem:[%s6264_s3 + $0x7d8] sm:$0xff] %vm2823_vm2, %v2612_v47  ;;  %v1996_v50 = vadd.f32 %v5419_v52, %v1995_v48  ;;  %v2604_v51 = vadd.f32 %v5419_v52, %v2603_v49 }
 0x1aa   :  { %v3696_v53 = vpop.f32.mrf.mxu0  ;;  %v3848_v54 = vpop.f32.mrf.mxu1 }
 0x1ab   :  { %2921 = vst.msk [vmem:[%s6264_s3 + $0x308] sm:$0xff] %vm2823_vm2, %v1996_v50  ;;  %3073 = vst.msk [vmem:[%s6264_s3 + $0x7c8] sm:$0xff] %vm2823_vm2, %v2604_v51  ;;  %v2017_v55 = vadd.f32 %v5419_v52, %v3696_v53  ;;  %v2625_v42 = vadd.f32 %v5419_v52, %v3848_v54 }
 0x1ac   :  { %v2008_v56 = vpop.f32.mrf.mxu0  ;;  %v2616_v57 = vpop.f32.mrf.mxu1 }
 0x1ad   :  { %2926 = vst.msk [vmem:[%s6264_s3 + $0x330] sm:$0xff] %vm2823_vm2, %v2017_v55  ;;  %3078 = vst.msk [vmem:[%s6264_s3 + $0x7f0] sm:$0xff] %vm2823_vm2, %v2625_v42  ;;  %v2009_v58 = vadd.f32 %v5419_v52, %v2008_v56  ;;  %v2617_v59 = vadd.f32 %v5419_v52, %v2616_v57 }
 0x1ae   :  { %v3697_v60 = vpop.f32.mrf.mxu0  ;;  %v3849_v61 = vpop.f32.mrf.mxu1 }
 0x1af   :  { %2924 = vst.msk [vmem:[%s6264_s3 + $0x320] sm:$0xff] %vm2823_vm2, %v2009_v58  ;;  %3076 = vst.msk [vmem:[%s6264_s3 + $0x7e0] sm:$0xff] %vm2823_vm2, %v2617_v59  ;;  %v2020_v62 = vadd.f32 %v5419_v52, %v3697_v60  ;;  %v2628_v63 = vadd.f32 %v5419_v52, %v3849_v61 }
 0x1b0   :  { %v2011_v0 = vpop.f32.mrf.mxu0  ;;  %v2619_v1 = vpop.f32.mrf.mxu1 }
 0x1b1   :  { %2927 = vst.msk [vmem:[%s6264_s3 + $0x338] sm:$0xff] %vm2823_vm2, %v2020_v62  ;;  %3079 = vst.msk [vmem:[%s6264_s3 + $0x7f8] sm:$0xff] %vm2823_vm2, %v2628_v63  ;;  %v2012_v2 = vadd.f32 %v5419_v52, %v2011_v0  ;;  %v2620_v3 = vadd.f32 %v5419_v52, %v2619_v1 }
 0x1b2   :  { %v3700_v4 = vpop.f32.mrf.mxu0  ;;  %v3852_v5 = vpop.f32.mrf.mxu1 }
 0x1b3   :  { %2925 = vst.msk [vmem:[%s6264_s3 + $0x328] sm:$0xff] %vm2823_vm2, %v2012_v2  ;;  %3077 = vst.msk [vmem:[%s6264_s3 + $0x7e8] sm:$0xff] %vm2823_vm2, %v2620_v3  ;;  %v2033_v6 = vadd.f32 %v5419_v52, %v3700_v4  ;;  %v2641_v7 = vadd.f32 %v5419_v52, %v3852_v5 }
 0x1b4   :  { %v2024_v8 = vpop.f32.mrf.mxu0  ;;  %v2632_v9 = vpop.f32.mrf.mxu1 }
 0x1b5   :  { %2930 = vst.msk [vmem:[%s6264_s3 + $0x350] sm:$0xff] %vm2823_vm2, %v2033_v6  ;;  %3082 = vst.msk [vmem:[%s6264_s3 + $0x810] sm:$0xff] %vm2823_vm2, %v2641_v7  ;;  %v2025_v10 = vadd.f32 %v5419_v52, %v2024_v8  ;;  %v2633_v11 = vadd.f32 %v5419_v52, %v2632_v9 }
 0x1b6   :  { %v3701_v12 = vpop.f32.mrf.mxu0  ;;  %v3853_v13 = vpop.f32.mrf.mxu1 }
 0x1b7   :  { %2928 = vst.msk [vmem:[%s6264_s3 + $0x340] sm:$0xff] %vm2823_vm2, %v2025_v10  ;;  %3080 = vst.msk [vmem:[%s6264_s3 + $0x800] sm:$0xff] %vm2823_vm2, %v2633_v11  ;;  %v2036_v14 = vadd.f32 %v5419_v52, %v3701_v12  ;;  %v2644_v15 = vadd.f32 %v5419_v52, %v3853_v13 }
 0x1b8   :  { %v2027_v16 = vpop.f32.mrf.mxu0  ;;  %v2635_v17 = vpop.f32.mrf.mxu1 }
 0x1b9   :  { %2931 = vst.msk [vmem:[%s6264_s3 + $0x358] sm:$0xff] %vm2823_vm2, %v2036_v14  ;;  %3083 = vst.msk [vmem:[%s6264_s3 + $0x818] sm:$0xff] %vm2823_vm2, %v2644_v15  ;;  %v2028_v18 = vadd.f32 %v5419_v52, %v2027_v16  ;;  %v2636_v19 = vadd.f32 %v5419_v52, %v2635_v17 }
 0x1ba   :  { %v3704_v20 = vpop.f32.mrf.mxu0  ;;  %v3856_v21 = vpop.f32.mrf.mxu1 }
 0x1bb   :  { %2929 = vst.msk [vmem:[%s6264_s3 + $0x348] sm:$0xff] %vm2823_vm2, %v2028_v18  ;;  %3081 = vst.msk [vmem:[%s6264_s3 + $0x808] sm:$0xff] %vm2823_vm2, %v2636_v19  ;;  %v2049_v22 = vadd.f32 %v5419_v52, %v3704_v20  ;;  %v2657_v23 = vadd.f32 %v5419_v52, %v3856_v21 }
 0x1bc   :  { %v2040_v24 = vpop.f32.mrf.mxu0  ;;  %v2648_v25 = vpop.f32.mrf.mxu1 }
 0x1bd   :  { %2934 = vst.msk [vmem:[%s6264_s3 + $0x370] sm:$0xff] %vm2823_vm2, %v2049_v22  ;;  %3086 = vst.msk [vmem:[%s6264_s3 + $0x830] sm:$0xff] %vm2823_vm2, %v2657_v23  ;;  %v2041_v26 = vadd.f32 %v5419_v52, %v2040_v24  ;;  %v2649_v27 = vadd.f32 %v5419_v52, %v2648_v25 }
 0x1be   :  { %v3705_v28 = vpop.f32.mrf.mxu0  ;;  %v3857_v29 = vpop.f32.mrf.mxu1 }
 0x1bf   :  { %2932 = vst.msk [vmem:[%s6264_s3 + $0x360] sm:$0xff] %vm2823_vm2, %v2041_v26  ;;  %3084 = vst.msk [vmem:[%s6264_s3 + $0x820] sm:$0xff] %vm2823_vm2, %v2649_v27  ;;  %v2052_v30 = vadd.f32 %v5419_v52, %v3705_v28  ;;  %v2660_v31 = vadd.f32 %v5419_v52, %v3857_v29 }
 0x1c0   :  { %v2043_v32 = vpop.f32.mrf.mxu0  ;;  %v2651_v33 = vpop.f32.mrf.mxu1 }
 0x1c1   :  { %2935 = vst.msk [vmem:[%s6264_s3 + $0x378] sm:$0xff] %vm2823_vm2, %v2052_v30  ;;  %3087 = vst.msk [vmem:[%s6264_s3 + $0x838] sm:$0xff] %vm2823_vm2, %v2660_v31  ;;  %v2044_v34 = vadd.f32 %v5419_v52, %v2043_v32  ;;  %v2652_v35 = vadd.f32 %v5419_v52, %v2651_v33 }
 0x1c2   :  { %v3708_v36 = vpop.f32.mrf.mxu0  ;;  %v3860_v37 = vpop.f32.mrf.mxu1 }
 0x1c3   :  { %2933 = vst.msk [vmem:[%s6264_s3 + $0x368] sm:$0xff] %vm2823_vm2, %v2044_v34  ;;  %3085 = vst.msk [vmem:[%s6264_s3 + $0x828] sm:$0xff] %vm2823_vm2, %v2652_v35  ;;  %v2065_v38 = vadd.f32 %v5419_v52, %v3708_v36  ;;  %v2673_v39 = vadd.f32 %v5419_v52, %v3860_v37 }
 0x1c4   :  { %v2056_v40 = vpop.f32.mrf.mxu0  ;;  %v2664_v41 = vpop.f32.mrf.mxu1 }
 0x1c5   :  { %2938 = vst.msk [vmem:[%s6264_s3 + $0x390] sm:$0xff] %vm2823_vm2, %v2065_v38  ;;  %3090 = vst.msk [vmem:[%s6264_s3 + $0x850] sm:$0xff] %vm2823_vm2, %v2673_v39  ;;  %v2057_v43 = vadd.f32 %v5419_v52, %v2056_v40  ;;  %v2665_v44 = vadd.f32 %v5419_v52, %v2664_v41 }
 0x1c6   :  { %v3709_v45 = vpop.f32.mrf.mxu0  ;;  %v3861_v46 = vpop.f32.mrf.mxu1 }
 0x1c7   :  { %2936 = vst.msk [vmem:[%s6264_s3 + $0x380] sm:$0xff] %vm2823_vm2, %v2057_v43  ;;  %3088 = vst.msk [vmem:[%s6264_s3 + $0x840] sm:$0xff] %vm2823_vm2, %v2665_v44  ;;  %v2068_v47 = vadd.f32 %v5419_v52, %v3709_v45  ;;  %v2676_v48 = vadd.f32 %v5419_v52, %v3861_v46 }
 0x1c8   :  { %v2059_v49 = vpop.f32.mrf.mxu0  ;;  %v2667_v50 = vpop.f32.mrf.mxu1 }
 0x1c9   :  { %2939 = vst.msk [vmem:[%s6264_s3 + $0x398] sm:$0xff] %vm2823_vm2, %v2068_v47  ;;  %3091 = vst.msk [vmem:[%s6264_s3 + $0x858] sm:$0xff] %vm2823_vm2, %v2676_v48  ;;  %v2060_v51 = vadd.f32 %v5419_v52, %v2059_v49  ;;  %v2668_v53 = vadd.f32 %v5419_v52, %v2667_v50 }
 0x1ca   :  { %v3712_v54 = vpop.f32.mrf.mxu0  ;;  %v3864_v55 = vpop.f32.mrf.mxu1 }
 0x1cb   :  { %2937 = vst.msk [vmem:[%s6264_s3 + $0x388] sm:$0xff] %vm2823_vm2, %v2060_v51  ;;  %3089 = vst.msk [vmem:[%s6264_s3 + $0x848] sm:$0xff] %vm2823_vm2, %v2668_v53  ;;  %v2081_v42 = vadd.f32 %v5419_v52, %v3712_v54  ;;  %v2689_v56 = vadd.f32 %v5419_v52, %v3864_v55 }
 0x1cc   :  { %v2072_v57 = vpop.f32.mrf.mxu0  ;;  %v2680_v58 = vpop.f32.mrf.mxu1 }
 0x1cd   :  { %2942 = vst.msk [vmem:[%s6264_s3 + $0x3b0] sm:$0xff] %vm2823_vm2, %v2081_v42  ;;  %3094 = vst.msk [vmem:[%s6264_s3 + $0x870] sm:$0xff] %vm2823_vm2, %v2689_v56  ;;  %v2073_v59 = vadd.f32 %v5419_v52, %v2072_v57  ;;  %v2681_v60 = vadd.f32 %v5419_v52, %v2680_v58 }
 0x1ce   :  { %v3713_v61 = vpop.f32.mrf.mxu0  ;;  %v3865_v62 = vpop.f32.mrf.mxu1 }
 0x1cf   :  { %2940 = vst.msk [vmem:[%s6264_s3 + $0x3a0] sm:$0xff] %vm2823_vm2, %v2073_v59  ;;  %3092 = vst.msk [vmem:[%s6264_s3 + $0x860] sm:$0xff] %vm2823_vm2, %v2681_v60  ;;  %v2084_v63 = vadd.f32 %v5419_v52, %v3713_v61  ;;  %v2692_v0 = vadd.f32 %v5419_v52, %v3865_v62 }
 0x1d0   :  { %v2075_v1 = vpop.f32.mrf.mxu0  ;;  %v2683_v2 = vpop.f32.mrf.mxu1 }
 0x1d1   :  { %2943 = vst.msk [vmem:[%s6264_s3 + $0x3b8] sm:$0xff] %vm2823_vm2, %v2084_v63  ;;  %3095 = vst.msk [vmem:[%s6264_s3 + $0x878] sm:$0xff] %vm2823_vm2, %v2692_v0  ;;  %v2076_v3 = vadd.f32 %v5419_v52, %v2075_v1  ;;  %v2684_v4 = vadd.f32 %v5419_v52, %v2683_v2 }
 0x1d2   :  { %v3716_v5 = vpop.f32.mrf.mxu0  ;;  %v3868_v6 = vpop.f32.mrf.mxu1 }
 0x1d3   :  { %2941 = vst.msk [vmem:[%s6264_s3 + $0x3a8] sm:$0xff] %vm2823_vm2, %v2076_v3  ;;  %3093 = vst.msk [vmem:[%s6264_s3 + $0x868] sm:$0xff] %vm2823_vm2, %v2684_v4  ;;  %v2097_v7 = vadd.f32 %v5419_v52, %v3716_v5  ;;  %v2705_v8 = vadd.f32 %v5419_v52, %v3868_v6 }
 0x1d4   :  { %v2088_v9 = vpop.f32.mrf.mxu0  ;;  %v2696_v10 = vpop.f32.mrf.mxu1 }
 0x1d5   :  { %2946 = vst.msk [vmem:[%s6264_s3 + $0x3d0] sm:$0xff] %vm2823_vm2, %v2097_v7  ;;  %3098 = vst.msk [vmem:[%s6264_s3 + $0x890] sm:$0xff] %vm2823_vm2, %v2705_v8  ;;  %v2089_v11 = vadd.f32 %v5419_v52, %v2088_v9  ;;  %v2697_v12 = vadd.f32 %v5419_v52, %v2696_v10 }
 0x1d6   :  { %v3717_v13 = vpop.f32.mrf.mxu0  ;;  %v3869_v14 = vpop.f32.mrf.mxu1 }
 0x1d7   :  { %2944 = vst.msk [vmem:[%s6264_s3 + $0x3c0] sm:$0xff] %vm2823_vm2, %v2089_v11  ;;  %3096 = vst.msk [vmem:[%s6264_s3 + $0x880] sm:$0xff] %vm2823_vm2, %v2697_v12  ;;  %v2100_v15 = vadd.f32 %v5419_v52, %v3717_v13  ;;  %v2708_v16 = vadd.f32 %v5419_v52, %v3869_v14 }
 0x1d8   :  { %v2091_v17 = vpop.f32.mrf.mxu0  ;;  %v2699_v18 = vpop.f32.mrf.mxu1 }
 0x1d9   :  { %2947 = vst.msk [vmem:[%s6264_s3 + $0x3d8] sm:$0xff] %vm2823_vm2, %v2100_v15  ;;  %3099 = vst.msk [vmem:[%s6264_s3 + $0x898] sm:$0xff] %vm2823_vm2, %v2708_v16  ;;  %v2092_v19 = vadd.f32 %v5419_v52, %v2091_v17  ;;  %v2700_v20 = vadd.f32 %v5419_v52, %v2699_v18 }
 0x1da   :  { %v3720_v21 = vpop.f32.mrf.mxu0  ;;  %v3872_v22 = vpop.f32.mrf.mxu1 }
 0x1db   :  { %2945 = vst.msk [vmem:[%s6264_s3 + $0x3c8] sm:$0xff] %vm2823_vm2, %v2092_v19  ;;  %3097 = vst.msk [vmem:[%s6264_s3 + $0x888] sm:$0xff] %vm2823_vm2, %v2700_v20  ;;  %v2113_v23 = vadd.f32 %v5419_v52, %v3720_v21  ;;  %v2721_v24 = vadd.f32 %v5419_v52, %v3872_v22 }
 0x1dc   :  { %v2104_v25 = vpop.f32.mrf.mxu0  ;;  %v2712_v26 = vpop.f32.mrf.mxu1 }
 0x1dd   :  { %2950 = vst.msk [vmem:[%s6264_s3 + $0x3f0] sm:$0xff] %vm2823_vm2, %v2113_v23  ;;  %3102 = vst.msk [vmem:[%s6264_s3 + $0x8b0] sm:$0xff] %vm2823_vm2, %v2721_v24  ;;  %v2105_v27 = vadd.f32 %v5419_v52, %v2104_v25  ;;  %v2713_v28 = vadd.f32 %v5419_v52, %v2712_v26 }
 0x1de   :  { %v3721_v29 = vpop.f32.mrf.mxu0  ;;  %v3873_v30 = vpop.f32.mrf.mxu1 }
 0x1df   :  { %2948 = vst.msk [vmem:[%s6264_s3 + $0x3e0] sm:$0xff] %vm2823_vm2, %v2105_v27  ;;  %3100 = vst.msk [vmem:[%s6264_s3 + $0x8a0] sm:$0xff] %vm2823_vm2, %v2713_v28  ;;  %v2116_v31 = vadd.f32 %v5419_v52, %v3721_v29  ;;  %v2724_v32 = vadd.f32 %v5419_v52, %v3873_v30 }
 0x1e0   :  { %v2107_v33 = vpop.f32.mrf.mxu0  ;;  %v2715_v34 = vpop.f32.mrf.mxu1 }
 0x1e1   :  { %2951 = vst.msk [vmem:[%s6264_s3 + $0x3f8] sm:$0xff] %vm2823_vm2, %v2116_v31  ;;  %3103 = vst.msk [vmem:[%s6264_s3 + $0x8b8] sm:$0xff] %vm2823_vm2, %v2724_v32  ;;  %v2108_v35 = vadd.f32 %v5419_v52, %v2107_v33  ;;  %v2716_v36 = vadd.f32 %v5419_v52, %v2715_v34 }
 0x1e2   :  { %v3724_v37 = vpop.f32.mrf.mxu0  ;;  %v3876_v38 = vpop.f32.mrf.mxu1 }
 0x1e3   :  { %2949 = vst.msk [vmem:[%s6264_s3 + $0x3e8] sm:$0xff] %vm2823_vm2, %v2108_v35  ;;  %3101 = vst.msk [vmem:[%s6264_s3 + $0x8a8] sm:$0xff] %vm2823_vm2, %v2716_v36  ;;  %v2129_v39 = vadd.f32 %v5419_v52, %v3724_v37  ;;  %v2737_v40 = vadd.f32 %v5419_v52, %v3876_v38 }
 0x1e4   :  { %v2120_v41 = vpop.f32.mrf.mxu0  ;;  %v2728_v43 = vpop.f32.mrf.mxu1 }
 0x1e5   :  { %2954 = vst.msk [vmem:[%s6264_s3 + $0x410] sm:$0xff] %vm2823_vm2, %v2129_v39  ;;  %3106 = vst.msk [vmem:[%s6264_s3 + $0x8d0] sm:$0xff] %vm2823_vm2, %v2737_v40  ;;  %v2121_v44 = vadd.f32 %v5419_v52, %v2120_v41  ;;  %v2729_v45 = vadd.f32 %v5419_v52, %v2728_v43 }
 0x1e6   :  { %v3725_v46 = vpop.f32.mrf.mxu0  ;;  %v3877_v47 = vpop.f32.mrf.mxu1 }
 0x1e7   :  { %2952 = vst.msk [vmem:[%s6264_s3 + $0x400] sm:$0xff] %vm2823_vm2, %v2121_v44  ;;  %3104 = vst.msk [vmem:[%s6264_s3 + $0x8c0] sm:$0xff] %vm2823_vm2, %v2729_v45  ;;  %v2132_v48 = vadd.f32 %v5419_v52, %v3725_v46  ;;  %v2740_v49 = vadd.f32 %v5419_v52, %v3877_v47 }
 0x1e8   :  { %v2123_v50 = vpop.f32.mrf.mxu0  ;;  %v2731_v51 = vpop.f32.mrf.mxu1 }
 0x1e9   :  { %2955 = vst.msk [vmem:[%s6264_s3 + $0x418] sm:$0xff] %vm2823_vm2, %v2132_v48  ;;  %3107 = vst.msk [vmem:[%s6264_s3 + $0x8d8] sm:$0xff] %vm2823_vm2, %v2740_v49  ;;  %v2124_v53 = vadd.f32 %v5419_v52, %v2123_v50  ;;  %v2732_v54 = vadd.f32 %v5419_v52, %v2731_v51 }
 0x1ea   :  { %v3728_v55 = vpop.f32.mrf.mxu0  ;;  %v3880_v42 = vpop.f32.mrf.mxu1 }
 0x1eb   :  { %2953 = vst.msk [vmem:[%s6264_s3 + $0x408] sm:$0xff] %vm2823_vm2, %v2124_v53  ;;  %3105 = vst.msk [vmem:[%s6264_s3 + $0x8c8] sm:$0xff] %vm2823_vm2, %v2732_v54  ;;  %v2145_v56 = vadd.f32 %v5419_v52, %v3728_v55  ;;  %v2753_v57 = vadd.f32 %v5419_v52, %v3880_v42 }
 0x1ec   :  { %v2136_v58 = vpop.f32.mrf.mxu0  ;;  %v2744_v59 = vpop.f32.mrf.mxu1 }
 0x1ed   :  { %2958 = vst.msk [vmem:[%s6264_s3 + $0x430] sm:$0xff] %vm2823_vm2, %v2145_v56  ;;  %3110 = vst.msk [vmem:[%s6264_s3 + $0x8f0] sm:$0xff] %vm2823_vm2, %v2753_v57  ;;  %v2137_v60 = vadd.f32 %v5419_v52, %v2136_v58  ;;  %v2745_v61 = vadd.f32 %v5419_v52, %v2744_v59 }
 0x1ee   :  { %v3729_v62 = vpop.f32.mrf.mxu0  ;;  %v3881_v63 = vpop.f32.mrf.mxu1 }
 0x1ef   :  { %2956 = vst.msk [vmem:[%s6264_s3 + $0x420] sm:$0xff] %vm2823_vm2, %v2137_v60  ;;  %3108 = vst.msk [vmem:[%s6264_s3 + $0x8e0] sm:$0xff] %vm2823_vm2, %v2745_v61  ;;  %v2148_v0 = vadd.f32 %v5419_v52, %v3729_v62  ;;  %v2756_v1 = vadd.f32 %v5419_v52, %v3881_v63 }
 0x1f0   :  { %v2139_v2 = vpop.f32.mrf.mxu0  ;;  %v2747_v3 = vpop.f32.mrf.mxu1 }
 0x1f1   :  { %2959 = vst.msk [vmem:[%s6264_s3 + $0x438] sm:$0xff] %vm2823_vm2, %v2148_v0  ;;  %3111 = vst.msk [vmem:[%s6264_s3 + $0x8f8] sm:$0xff] %vm2823_vm2, %v2756_v1  ;;  %v2140_v4 = vadd.f32 %v5419_v52, %v2139_v2  ;;  %v2748_v5 = vadd.f32 %v5419_v52, %v2747_v3 }
 0x1f2   :  { %v3732_v6 = vpop.f32.mrf.mxu0  ;;  %v3884_v7 = vpop.f32.mrf.mxu1 }
 0x1f3   :  { %2957 = vst.msk [vmem:[%s6264_s3 + $0x428] sm:$0xff] %vm2823_vm2, %v2140_v4  ;;  %3109 = vst.msk [vmem:[%s6264_s3 + $0x8e8] sm:$0xff] %vm2823_vm2, %v2748_v5  ;;  %v2161_v8 = vadd.f32 %v5419_v52, %v3732_v6  ;;  %v2769_v9 = vadd.f32 %v5419_v52, %v3884_v7 }
 0x1f4   :  { %v2152_v10 = vpop.f32.mrf.mxu0  ;;  %v2760_v11 = vpop.f32.mrf.mxu1 }
 0x1f5   :  { %2962 = vst.msk [vmem:[%s6264_s3 + $0x450] sm:$0xff] %vm2823_vm2, %v2161_v8  ;;  %3114 = vst.msk [vmem:[%s6264_s3 + $0x910] sm:$0xff] %vm2823_vm2, %v2769_v9  ;;  %v2153_v12 = vadd.f32 %v5419_v52, %v2152_v10  ;;  %v2761_v13 = vadd.f32 %v5419_v52, %v2760_v11 }
 0x1f6   :  { %v3733_v14 = vpop.f32.mrf.mxu0  ;;  %v3885_v15 = vpop.f32.mrf.mxu1 }
 0x1f7   :  { %2960 = vst.msk [vmem:[%s6264_s3 + $0x440] sm:$0xff] %vm2823_vm2, %v2153_v12  ;;  %3112 = vst.msk [vmem:[%s6264_s3 + $0x900] sm:$0xff] %vm2823_vm2, %v2761_v13  ;;  %v2164_v16 = vadd.f32 %v5419_v52, %v3733_v14  ;;  %v2772_v17 = vadd.f32 %v5419_v52, %v3885_v15 }
 0x1f8   :  { %v2155_v18 = vpop.f32.mrf.mxu0  ;;  %v2763_v19 = vpop.f32.mrf.mxu1 }
 0x1f9   :  { %2963 = vst.msk [vmem:[%s6264_s3 + $0x458] sm:$0xff] %vm2823_vm2, %v2164_v16  ;;  %3115 = vst.msk [vmem:[%s6264_s3 + $0x918] sm:$0xff] %vm2823_vm2, %v2772_v17  ;;  %v2156_v20 = vadd.f32 %v5419_v52, %v2155_v18  ;;  %v2764_v21 = vadd.f32 %v5419_v52, %v2763_v19 }
 0x1fa   :  { %v3736_v22 = vpop.f32.mrf.mxu0  ;;  %v3888_v23 = vpop.f32.mrf.mxu1 }
 0x1fb   :  { %2961 = vst.msk [vmem:[%s6264_s3 + $0x448] sm:$0xff] %vm2823_vm2, %v2156_v20  ;;  %3113 = vst.msk [vmem:[%s6264_s3 + $0x908] sm:$0xff] %vm2823_vm2, %v2764_v21  ;;  %v2177_v24 = vadd.f32 %v5419_v52, %v3736_v22  ;;  %v2785_v25 = vadd.f32 %v5419_v52, %v3888_v23 }
 0x1fc   :  { %v2168_v26 = vpop.f32.mrf.mxu0  ;;  %v2776_v27 = vpop.f32.mrf.mxu1 }
 0x1fd   :  { %2966 = vst.msk [vmem:[%s6264_s3 + $0x470] sm:$0xff] %vm2823_vm2, %v2177_v24  ;;  %3118 = vst.msk [vmem:[%s6264_s3 + $0x930] sm:$0xff] %vm2823_vm2, %v2785_v25  ;;  %v2169_v28 = vadd.f32 %v5419_v52, %v2168_v26  ;;  %v2777_v29 = vadd.f32 %v5419_v52, %v2776_v27 }
 0x1fe   :  { %v3737_v30 = vpop.f32.mrf.mxu0  ;;  %v3889_v31 = vpop.f32.mrf.mxu1 }
 0x1ff   :  { %2964 = vst.msk [vmem:[%s6264_s3 + $0x460] sm:$0xff] %vm2823_vm2, %v2169_v28  ;;  %3116 = vst.msk [vmem:[%s6264_s3 + $0x920] sm:$0xff] %vm2823_vm2, %v2777_v29  ;;  %v2180_v32 = vadd.f32 %v5419_v52, %v3737_v30  ;;  %v2788_v33 = vadd.f32 %v5419_v52, %v3889_v31 }
 0x200   :  { %v2171_v34 = vpop.f32.mrf.mxu0  ;;  %v2779_v35 = vpop.f32.mrf.mxu1 }
 0x201   :  { %2967 = vst.msk [vmem:[%s6264_s3 + $0x478] sm:$0xff] %vm2823_vm2, %v2180_v32  ;;  %3119 = vst.msk [vmem:[%s6264_s3 + $0x938] sm:$0xff] %vm2823_vm2, %v2788_v33  ;;  %v2172_v36 = vadd.f32 %v5419_v52, %v2171_v34  ;;  %v2780_v37 = vadd.f32 %v5419_v52, %v2779_v35 }
 0x202   :  { %v3740_v38 = vpop.f32.mrf.mxu0  ;;  %v3892_v39 = vpop.f32.mrf.mxu1 }
 0x203   :  { %2965 = vst.msk [vmem:[%s6264_s3 + $0x468] sm:$0xff] %vm2823_vm2, %v2172_v36  ;;  %3117 = vst.msk [vmem:[%s6264_s3 + $0x928] sm:$0xff] %vm2823_vm2, %v2780_v37  ;;  %v2193_v40 = vadd.f32 %v5419_v52, %v3740_v38  ;;  %v2801_v41 = vadd.f32 %v5419_v52, %v3892_v39 }
 0x204   :  { %v2184_v43 = vpop.f32.mrf.mxu0  ;;  %v2792_v44 = vpop.f32.mrf.mxu1 }
 0x205   :  { %2970 = vst.msk [vmem:[%s6264_s3 + $0x490] sm:$0xff] %vm2823_vm2, %v2193_v40  ;;  %3122 = vst.msk [vmem:[%s6264_s3 + $0x950] sm:$0xff] %vm2823_vm2, %v2801_v41  ;;  %v2185_v45 = vadd.f32 %v5419_v52, %v2184_v43  ;;  %v2793_v46 = vadd.f32 %v5419_v52, %v2792_v44 }
 0x206   :  { %v3741_v47 = vpop.f32.mrf.mxu0  ;;  %v3893_v48 = vpop.f32.mrf.mxu1 }
 0x207   :  { %2968 = vst.msk [vmem:[%s6264_s3 + $0x480] sm:$0xff] %vm2823_vm2, %v2185_v45  ;;  %3120 = vst.msk [vmem:[%s6264_s3 + $0x940] sm:$0xff] %vm2823_vm2, %v2793_v46  ;;  %v2196_v49 = vadd.f32 %v5419_v52, %v3741_v47  ;;  %v2804_v50 = vadd.f32 %v5419_v52, %v3893_v48 }
 0x208   :  { %v2187_v51 = vpop.f32.mrf.mxu0  ;;  %v2795_v53 = vpop.f32.mrf.mxu1 }
 0x209   :  { %2971 = vst.msk [vmem:[%s6264_s3 + $0x498] sm:$0xff] %vm2823_vm2, %v2196_v49  ;;  %3123 = vst.msk [vmem:[%s6264_s3 + $0x958] sm:$0xff] %vm2823_vm2, %v2804_v50  ;;  %v2188_v54 = vadd.f32 %v5419_v52, %v2187_v51  ;;  %v2796_v55 = vadd.f32 %v5419_v52, %v2795_v53 }
 0x20a   :  { %v3744_v42 = vpop.f32.mrf.mxu0  ;;  %v3896_v56 = vpop.f32.mrf.mxu1 }
 0x20b   :  { %2969 = vst.msk [vmem:[%s6264_s3 + $0x488] sm:$0xff] %vm2823_vm2, %v2188_v54  ;;  %3121 = vst.msk [vmem:[%s6264_s3 + $0x948] sm:$0xff] %vm2823_vm2, %v2796_v55  ;;  %v2209_v57 = vadd.f32 %v5419_v52, %v3744_v42  ;;  %v2817_v58 = vadd.f32 %v5419_v52, %v3896_v56 }
 0x20c   :  { %v2200_v59 = vpop.f32.mrf.mxu0  ;;  %v2808_v60 = vpop.f32.mrf.mxu1 }
 0x20d   :  { %2974 = vst.msk [vmem:[%s6264_s3 + $0x4b0] sm:$0xff] %vm2823_vm2, %v2209_v57  ;;  %3126 = vst.msk [vmem:[%s6264_s3 + $0x970] sm:$0xff] %vm2823_vm2, %v2817_v58  ;;  %v2201_v61 = vadd.f32 %v5419_v52, %v2200_v59  ;;  %v2809_v62 = vadd.f32 %v5419_v52, %v2808_v60 }
 0x20e   :  { %v3745_v63 = vpop.f32.mrf.mxu0  ;;  %v3897_v0 = vpop.f32.mrf.mxu1 }
 0x20f   :  { %2972 = vst.msk [vmem:[%s6264_s3 + $0x4a0] sm:$0xff] %vm2823_vm2, %v2201_v61  ;;  %3124 = vst.msk [vmem:[%s6264_s3 + $0x960] sm:$0xff] %vm2823_vm2, %v2809_v62  ;;  %v2212_v1 = vadd.f32 %v5419_v52, %v3745_v63  ;;  %v2820_v2 = vadd.f32 %v5419_v52, %v3897_v0 }
 0x210   :  { %v2203_v3 = vpop.f32.mrf.mxu0  ;;  %v2811_v4 = vpop.f32.mrf.mxu1 }
 0x211   :  { %2975 = vst.msk [vmem:[%s6264_s3 + $0x4b8] sm:$0xff] %vm2823_vm2, %v2212_v1  ;;  %3127 = vst.msk [vmem:[%s6264_s3 + $0x978] sm:$0xff] %vm2823_vm2, %v2820_v2  ;;  %v2204_v5 = vadd.f32 %v5419_v52, %v2203_v3  ;;  %v2812_v6 = vadd.f32 %v5419_v52, %v2811_v4 }
 0x213   :  { %2973 = vst.msk [vmem:[%s6264_s3 + $0x4a8] sm:$0xff] %vm2823_vm2, %v2204_v5  ;;  %3125 = vst.msk [vmem:[%s6264_s3 + $0x968] sm:$0xff] %vm2823_vm2, %v2812_v6 }
 0x214   :  { %3132 = vsyncpa [#allocation3], 1 }
 0x215   :  { %3133 = vsyncpa [#allocation5], 1 }

</bundles_post_ra>
